<compile_context>
chip_gen: v6e
topology: v6e:2x2x1
jax: 0.10.0
libtpu: 0.0.40
codegen_flags: <defaults>
</compile_context>

<pallas_src>
import math
import functools

import jax
import jax.numpy as jnp
from jax.experimental import pallas as pl
from jax.experimental.pallas import tpu as pltpu


def _mha_kernel(sem_ref, vis_ref,
                wq_ref, wkv_ref, wo_ref,
                bq_ref, bkv_ref, bo_ref,
                out_ref,
                *, num_heads: int):
    """Single invocation over the whole (tiny) batch.

    sem_ref: (L, N, E)  query source (seq-first, as PyTorch MHA)
    vis_ref: (S, N, E)  key/value source
    wq_ref : (E, E)     bf16, already transposed and scaled by 1/sqrt(dh)
    wkv_ref: (E, 2E)    bf16, [Wk^T | Wv^T]
    wo_ref : (E, E)     bf16, transposed
    b*_ref : f32 biases (bq scaled by 1/sqrt(dh); bkv = [bk | bv])
    out_ref: (N, L, E)
    """
    L, N, E = sem_ref.shape
    dh = E // num_heads

    # Grid-invariant weights / biases: load once.
    wq = wq_ref[...]          # (E, E)   bf16
    wkv = wkv_ref[...]        # (E, 2E)  bf16
    wo = wo_ref[...]          # (E, E)   bf16
    bq = bq_ref[...]          # (1, E)   f32
    bkv = bkv_ref[...]        # (1, 2E)  f32
    bo = bo_ref[...]          # (1, E)   f32

    sem = sem_ref[...]        # (L, N, E) f32
    vis = vis_ref[...]        # (S, N, E) f32

    for n in range(N):        # static unroll over the small batch
        x = sem[:, n, :].astype(jnp.bfloat16)    # (L, E)
        z = vis[:, n, :].astype(jnp.bfloat16)    # (S, E)

        # Projections: bf16 operands on the MXU, f32 accumulation.
        q = jnp.dot(x, wq, preferred_element_type=jnp.float32) + bq     # (L, E)  (pre-scaled)
        kv = jnp.dot(z, wkv, preferred_element_type=jnp.float32) + bkv  # (S, 2E) fused K|V
        k = kv[:, :E]                                                   # (S, E)
        v = kv[:, E:]                                                   # (S, E)

        out_acc = jnp.zeros((L, E), jnp.float32)
        for h in range(num_heads):
            sl = slice(h * dh, (h + 1) * dh)
            qh = q[:, sl].astype(jnp.bfloat16)   # (L, dh)
            kh = k[:, sl].astype(jnp.bfloat16)   # (S, dh)
            vh = v[:, sl].astype(jnp.bfloat16)   # (S, dh)

            # Scores (scale already folded into wq/bq); NT matmul, f32 accumulate.
            s = jax.lax.dot_general(qh, kh, (((1,), (1,)), ((), ())),
                                    preferred_element_type=jnp.float32)  # (L, S)

            # Numerically stable, *unnormalized* softmax in f32.
            s = s - jnp.max(s, axis=-1, keepdims=True)
            p = jnp.exp(s)                                   # (L, S) f32
            row_sum = jnp.sum(p, axis=-1, keepdims=True)     # (L, 1) f32, >= 1

            oh = jnp.dot(p.astype(jnp.bfloat16), vh,
                         preferred_element_type=jnp.float32)  # (L, dh)
            # Deferred normalization on the small head output (EUP reciprocal).
            oh = oh * pl.reciprocal(row_sum, approx=True)

            # Accumulate straight into the output projection: no lane-axis concat.
            out_acc = out_acc + jnp.dot(oh.astype(jnp.bfloat16), wo[sl, :],
                                        preferred_element_type=jnp.float32)

        out_ref[n] = (out_acc + bo).astype(out_ref.dtype)


def cross_attention_pallas(semantic, visual, params, num_heads):
    """semantic: (L, N, E), visual: (S, N, E) -> (L, N, E)  (PyTorch MHA convention)."""
    L, N, E = semantic.shape
    S = visual.shape[0]
    assert E % num_heads == 0, "embed_dim must be divisible by num_heads"
    dh = E // num_heads
    scale = 1.0 / math.sqrt(dh)

    # nn.MultiheadAttention projection is x @ W^T + b; pre-transpose, fuse K|V,
    # fold the query scale, and cast matmul weights to bf16 (biases stay f32).
    wq = (params["wq"].T * scale).astype(jnp.bfloat16)                       # (E, E)
    wkv = jnp.concatenate([params["wk"].T, params["wv"].T], axis=1).astype(jnp.bfloat16)  # (E, 2E)
    wo = params["wo"].T.astype(jnp.bfloat16)                                 # (E, E)
    bq = (params["bq"] * scale).reshape(1, E).astype(jnp.float32)
    bkv = jnp.concatenate([params["bk"], params["bv"]]).reshape(1, 2 * E).astype(jnp.float32)
    bo = params["bo"].reshape(1, E).astype(jnp.float32)

    kernel = functools.partial(_mha_kernel, num_heads=num_heads)

    out_b = pl.pallas_call(
        kernel,
        out_shape=jax.ShapeDtypeStruct((N, L, E), jnp.float32),
        grid=(1,),
        in_specs=[
            pl.BlockSpec((L, N, E), lambda i: (0, 0, 0)),     # semantic, seq-first, full block
            pl.BlockSpec((S, N, E), lambda i: (0, 0, 0)),     # visual, seq-first, full block
            pl.BlockSpec((E, E), lambda i: (0, 0)),           # wq (bf16, scaled)
            pl.BlockSpec((E, 2 * E), lambda i: (0, 0)),       # wkv (bf16)
            pl.BlockSpec((E, E), lambda i: (0, 0)),           # wo (bf16)
            pl.BlockSpec((1, E), lambda i: (0, 0)),           # bq
            pl.BlockSpec((1, 2 * E), lambda i: (0, 0)),       # bkv
            pl.BlockSpec((1, E), lambda i: (0, 0)),           # bo
        ],
        out_specs=pl.BlockSpec((N, L, E), lambda i: (0, 0, 0)),
        compiler_params=pltpu.CompilerParams(
            dimension_semantics=("arbitrary",)),
    )(semantic, visual, wq, wkv, wo, bq, bkv, bo)

    # Only remaining layout op: tiny (N, L, E) -> (L, N, E) for the PyTorch seq-first contract.
    return jnp.transpose(out_b, (1, 0, 2))


def cross_attention_ref(semantic, visual, params, num_heads):
    """Pure-JAX f32 reference matching nn.MultiheadAttention forward."""
    L, N, E = semantic.shape
    S = visual.shape[0]
    dh = E // num_heads
    scale = 1.0 / math.sqrt(dh)

    q = jnp.einsum("lne,fe->lnf", semantic, params["wq"]) + params["bq"]
    k = jnp.einsum("sne,fe->snf", visual, params["wk"]) + params["bk"]
    v = jnp.einsum("sne,fe->snf", visual, params["wv"]) + params["bv"]

    q = q.reshape(L, N, num_heads, dh).transpose(1, 2, 0, 3)   # (N, H, L, dh)
    k = k.reshape(S, N, num_heads, dh).transpose(1, 2, 0, 3)   # (N, H, S, dh)
    v = v.reshape(S, N, num_heads, dh).transpose(1, 2, 0, 3)   # (N, H, S, dh)

    s = jnp.einsum("nhld,nhsd->nhls", q * scale, k)
    p = jax.nn.softmax(s, axis=-1)
    o = jnp.einsum("nhls,nhsd->nhld", p, v)                    # (N, H, L, dh)
    o = o.transpose(2, 0, 1, 3).reshape(L, N, E)
    return jnp.einsum("lne,fe->lnf", o, params["wo"]) + params["bo"]


def init_params(key, embed_dim):
    ks = jax.random.split(key, 5)
    std = 1.0 / math.sqrt(embed_dim)
    return {
        "wq": jax.random.normal(ks[0], (embed_dim, embed_dim), jnp.float32) * std,
        "wk": jax.random.normal(ks[1], (embed_dim, embed_dim), jnp.float32) * std,
        "wv": jax.random.normal(ks[2], (embed_dim, embed_dim), jnp.float32) * std,
        "wo": jax.random.normal(ks[3], (embed_dim, embed_dim), jnp.float32) * std,
        "bq": jnp.zeros((embed_dim,), jnp.float32),
        "bk": jax.random.normal(ks[4], (embed_dim,), jnp.float32) * 0.01,
        "bv": jnp.zeros((embed_dim,), jnp.float32),
        "bo": jnp.zeros((embed_dim,), jnp.float32),
    }


if __name__ == "__main__":
    # Small shapes: seq lengths L=8 / S=12, batch N=2, embed_dim E=32, heads=4.
    L, S, N, E, H = 8, 12, 2, 32, 4

    key = jax.random.PRNGKey(0)
    k_sem, k_vis, k_par = jax.random.split(key, 3)
    semantic = jax.random.normal(k_sem, (L, N, E), jnp.float32)
    visual = jax.random.normal(k_vis, (S, N, E), jnp.float32)
    params = init_params(k_par, E)

    out = cross_attention_pallas(semantic, visual, params, H)
    out = jax.block_until_ready(out)

    ref = cross_attention_ref(semantic, visual, params, H)
    assert out.shape == (L, N, E)
    # bf16 MXU operands (f32 accumulation) vs. pure-f32 reference -> looser tolerance.
    assert jnp.allclose(out, ref, atol=1e-1, rtol=1e-1), "mismatch vs reference"

    print("KERNEL_OK")
</pallas_src>

<mosaic_0001>
module attributes {stable_mosaic.version = 11 : i64} {
  func.func @_mha_kernel(%arg0: i32, %arg1: memref<8x2x32xf32, #tpu.memory_space<vmem>>, %arg2: memref<12x2x32xf32, #tpu.memory_space<vmem>>, %arg3: memref<32x32xbf16, #tpu.memory_space<vmem>>, %arg4: memref<32x64xbf16, #tpu.memory_space<vmem>>, %arg5: memref<32x32xbf16, #tpu.memory_space<vmem>>, %arg6: memref<1x32xf32, #tpu.memory_space<vmem>>, %arg7: memref<1x64xf32, #tpu.memory_space<vmem>>, %arg8: memref<1x32xf32, #tpu.memory_space<vmem>>, %arg9: memref<2x8x32xf32, #tpu.memory_space<vmem>>) attributes {dimension_semantics = [#tpu.dimension_semantics<arbitrary>], iteration_bounds = array<i64: 1>, scalar_prefetch = 0 : i64, scratch_operands = 0 : i64, tpu.core_type = #tpu.core_type<tc>, window_params = [{pipeline_mode = #tpu.pipeline_mode<synchronous>, transform_indices = @transform_0, window_bounds = array<i64: 8, 2, 32>}, {pipeline_mode = #tpu.pipeline_mode<synchronous>, transform_indices = @transform_1, window_bounds = array<i64: 12, 2, 32>}, {pipeline_mode = #tpu.pipeline_mode<synchronous>, transform_indices = @transform_2, window_bounds = array<i64: 32, 32>}, {pipeline_mode = #tpu.pipeline_mode<synchronous>, transform_indices = @transform_3, window_bounds = array<i64: 32, 64>}, {pipeline_mode = #tpu.pipeline_mode<synchronous>, transform_indices = @transform_4, window_bounds = array<i64: 32, 32>}, {pipeline_mode = #tpu.pipeline_mode<synchronous>, transform_indices = @transform_5, window_bounds = array<i64: 1, 32>}, {pipeline_mode = #tpu.pipeline_mode<synchronous>, transform_indices = @transform_6, window_bounds = array<i64: 1, 64>}, {pipeline_mode = #tpu.pipeline_mode<synchronous>, transform_indices = @transform_7, window_bounds = array<i64: 1, 32>}, {pipeline_mode = #tpu.pipeline_mode<synchronous>, transform_indices = @transform_8, window_bounds = array<i64: 2, 8, 32>}]} {
    %c0 = arith.constant 0 : index
    %c0_0 = arith.constant 0 : index
    %0 = vector.load %arg3[%c0, %c0_0] : memref<32x32xbf16, #tpu.memory_space<vmem>>, vector<32x32xbf16>
    %c0_1 = arith.constant 0 : index
    %c0_2 = arith.constant 0 : index
    %1 = vector.load %arg4[%c0_1, %c0_2] : memref<32x64xbf16, #tpu.memory_space<vmem>>, vector<32x64xbf16>
    %c0_3 = arith.constant 0 : index
    %c0_4 = arith.constant 0 : index
    %2 = vector.load %arg5[%c0_3, %c0_4] : memref<32x32xbf16, #tpu.memory_space<vmem>>, vector<32x32xbf16>
    %c0_5 = arith.constant 0 : index
    %c0_6 = arith.constant 0 : index
    %3 = vector.load %arg6[%c0_5, %c0_6] : memref<1x32xf32, #tpu.memory_space<vmem>>, vector<1x32xf32>
    %c0_7 = arith.constant 0 : index
    %c0_8 = arith.constant 0 : index
    %4 = vector.load %arg7[%c0_7, %c0_8] : memref<1x64xf32, #tpu.memory_space<vmem>>, vector<1x64xf32>
    %c0_9 = arith.constant 0 : index
    %c0_10 = arith.constant 0 : index
    %5 = vector.load %arg8[%c0_9, %c0_10] : memref<1x32xf32, #tpu.memory_space<vmem>>, vector<1x32xf32>
    %c0_11 = arith.constant 0 : index
    %c0_12 = arith.constant 0 : index
    %c0_13 = arith.constant 0 : index
    %6 = vector.load %arg1[%c0_11, %c0_12, %c0_13] : memref<8x2x32xf32, #tpu.memory_space<vmem>>, vector<8x2x32xf32>
    %c0_14 = arith.constant 0 : index
    %c0_15 = arith.constant 0 : index
    %c0_16 = arith.constant 0 : index
    %7 = vector.load %arg2[%c0_14, %c0_15, %c0_16] : memref<12x2x32xf32, #tpu.memory_space<vmem>>, vector<12x2x32xf32>
    %8 = vector.extract_strided_slice %6 {offsets = [0, 0, 0], sizes = [8, 1, 32], strides = [1, 1, 1]} : vector<8x2x32xf32> to vector<8x1x32xf32>
    %9 = vector.shape_cast %8 : vector<8x1x32xf32> to vector<8x32xf32>
    %10 = arith.truncf %9 : vector<8x32xf32> to vector<8x32xbf16>
    %11 = vector.extract_strided_slice %7 {offsets = [0, 0, 0], sizes = [12, 1, 32], strides = [1, 1, 1]} : vector<12x2x32xf32> to vector<12x1x32xf32>
    %12 = vector.shape_cast %11 : vector<12x1x32xf32> to vector<12x32xf32>
    %13 = arith.truncf %12 : vector<12x32xf32> to vector<12x32xbf16>
    %cst = arith.constant dense<0.000000e+00> : vector<8x32xf32>
    %14 = tpu.matmul %10, %0, %cst {dimension_numbers = #tpu.dot_dimension_numbers<[1], [0], [0], [1], [0, 0, 1, 1], [], []>} : vector<8x32xbf16>, vector<32x32xbf16>, vector<8x32xf32> -> vector<8x32xf32>
    %15 = vector.broadcast %3 : vector<1x32xf32> to vector<8x32xf32>
    %16 = arith.addf %14, %15 : vector<8x32xf32>
    %cst_17 = arith.constant dense<0.000000e+00> : vector<12x64xf32>
    %17 = tpu.matmul %13, %1, %cst_17 {dimension_numbers = #tpu.dot_dimension_numbers<[1], [0], [0], [1], [0, 0, 1, 1], [], []>} : vector<12x32xbf16>, vector<32x64xbf16>, vector<12x64xf32> -> vector<12x64xf32>
    %18 = vector.broadcast %4 : vector<1x64xf32> to vector<12x64xf32>
    %19 = arith.addf %17, %18 : vector<12x64xf32>
    %20 = vector.extract_strided_slice %19 {offsets = [0, 0], sizes = [12, 32], strides = [1, 1]} : vector<12x64xf32> to vector<12x32xf32>
    %21 = vector.extract_strided_slice %19 {offsets = [0, 32], sizes = [12, 32], strides = [1, 1]} : vector<12x64xf32> to vector<12x32xf32>
    %cst_18 = arith.constant 0.000000e+00 : f32
    %22 = vector.broadcast %cst_18 : f32 to vector<8x32xf32>
    %23 = vector.extract_strided_slice %16 {offsets = [0, 0], sizes = [8, 8], strides = [1, 1]} : vector<8x32xf32> to vector<8x8xf32>
    %24 = arith.truncf %23 : vector<8x8xf32> to vector<8x8xbf16>
    %25 = vector.extract_strided_slice %20 {offsets = [0, 0], sizes = [12, 8], strides = [1, 1]} : vector<12x32xf32> to vector<12x8xf32>
    %26 = arith.truncf %25 : vector<12x8xf32> to vector<12x8xbf16>
    %27 = vector.extract_strided_slice %21 {offsets = [0, 0], sizes = [12, 8], strides = [1, 1]} : vector<12x32xf32> to vector<12x8xf32>
    %28 = arith.truncf %27 : vector<12x8xf32> to vector<12x8xbf16>
    %cst_19 = arith.constant dense<0.000000e+00> : vector<8x12xf32>
    %29 = tpu.matmul %24, %26, %cst_19 {dimension_numbers = #tpu.dot_dimension_numbers<[1], [1], [0], [0], [0, 0, 1, 0], [], []>} : vector<8x8xbf16>, vector<12x8xbf16>, vector<8x12xf32> -> vector<8x12xf32>
    %cst_20 = arith.constant dense<0xFF800000> : vector<8xf32>
    %30 = vector.multi_reduction <maximumf>, %29, %cst_20 [1] : vector<8x12xf32> to vector<8xf32>
    %31 = vector.shape_cast %30 : vector<8xf32> to vector<8x1xf32>
    %32 = vector.broadcast %31 : vector<8x1xf32> to vector<8x12xf32>
    %33 = arith.subf %29, %32 : vector<8x12xf32>
    %34 = math.exp %33 : vector<8x12xf32>
    %cst_21 = arith.constant dense<0.000000e+00> : vector<8xf32>
    %35 = vector.multi_reduction <add>, %34, %cst_21 [1] : vector<8x12xf32> to vector<8xf32>
    %36 = vector.shape_cast %35 : vector<8xf32> to vector<8x1xf32>
    %37 = arith.truncf %34 : vector<8x12xf32> to vector<8x12xbf16>
    %cst_22 = arith.constant dense<0.000000e+00> : vector<8x8xf32>
    %38 = tpu.matmul %37, %28, %cst_22 {dimension_numbers = #tpu.dot_dimension_numbers<[1], [0], [0], [1], [0, 0, 1, 1], [], []>} : vector<8x12xbf16>, vector<12x8xbf16>, vector<8x8xf32> -> vector<8x8xf32>
    %39 = tpu.reciprocal %36 {approx = true} : vector<8x1xf32> -> vector<8x1xf32>
    %40 = vector.broadcast %39 : vector<8x1xf32> to vector<8x8xf32>
    %41 = arith.mulf %38, %40 : vector<8x8xf32>
    %42 = arith.truncf %41 : vector<8x8xf32> to vector<8x8xbf16>
    %43 = vector.extract_strided_slice %2 {offsets = [0, 0], sizes = [8, 32], strides = [1, 1]} : vector<32x32xbf16> to vector<8x32xbf16>
    %cst_23 = arith.constant dense<0.000000e+00> : vector<8x32xf32>
    %44 = tpu.matmul %42, %43, %cst_23 {dimension_numbers = #tpu.dot_dimension_numbers<[1], [0], [0], [1], [0, 0, 1, 1], [], []>} : vector<8x8xbf16>, vector<8x32xbf16>, vector<8x32xf32> -> vector<8x32xf32>
    %45 = arith.addf %22, %44 : vector<8x32xf32>
    %46 = vector.extract_strided_slice %16 {offsets = [0, 8], sizes = [8, 8], strides = [1, 1]} : vector<8x32xf32> to vector<8x8xf32>
    %47 = arith.truncf %46 : vector<8x8xf32> to vector<8x8xbf16>
    %48 = vector.extract_strided_slice %20 {offsets = [0, 8], sizes = [12, 8], strides = [1, 1]} : vector<12x32xf32> to vector<12x8xf32>
    %49 = arith.truncf %48 : vector<12x8xf32> to vector<12x8xbf16>
    %50 = vector.extract_strided_slice %21 {offsets = [0, 8], sizes = [12, 8], strides = [1, 1]} : vector<12x32xf32> to vector<12x8xf32>
    %51 = arith.truncf %50 : vector<12x8xf32> to vector<12x8xbf16>
    %cst_24 = arith.constant dense<0.000000e+00> : vector<8x12xf32>
    %52 = tpu.matmul %47, %49, %cst_24 {dimension_numbers = #tpu.dot_dimension_numbers<[1], [1], [0], [0], [0, 0, 1, 0], [], []>} : vector<8x8xbf16>, vector<12x8xbf16>, vector<8x12xf32> -> vector<8x12xf32>
    %cst_25 = arith.constant dense<0xFF800000> : vector<8xf32>
    %53 = vector.multi_reduction <maximumf>, %52, %cst_25 [1] : vector<8x12xf32> to vector<8xf32>
    %54 = vector.shape_cast %53 : vector<8xf32> to vector<8x1xf32>
    %55 = vector.broadcast %54 : vector<8x1xf32> to vector<8x12xf32>
    %56 = arith.subf %52, %55 : vector<8x12xf32>
    %57 = math.exp %56 : vector<8x12xf32>
    %cst_26 = arith.constant dense<0.000000e+00> : vector<8xf32>
    %58 = vector.multi_reduction <add>, %57, %cst_26 [1] : vector<8x12xf32> to vector<8xf32>
    %59 = vector.shape_cast %58 : vector<8xf32> to vector<8x1xf32>
    %60 = arith.truncf %57 : vector<8x12xf32> to vector<8x12xbf16>
    %cst_27 = arith.constant dense<0.000000e+00> : vector<8x8xf32>
    %61 = tpu.matmul %60, %51, %cst_27 {dimension_numbers = #tpu.dot_dimension_numbers<[1], [0], [0], [1], [0, 0, 1, 1], [], []>} : vector<8x12xbf16>, vector<12x8xbf16>, vector<8x8xf32> -> vector<8x8xf32>
    %62 = tpu.reciprocal %59 {approx = true} : vector<8x1xf32> -> vector<8x1xf32>
    %63 = vector.broadcast %62 : vector<8x1xf32> to vector<8x8xf32>
    %64 = arith.mulf %61, %63 : vector<8x8xf32>
    %65 = arith.truncf %64 : vector<8x8xf32> to vector<8x8xbf16>
    %66 = vector.extract_strided_slice %2 {offsets = [8, 0], sizes = [8, 32], strides = [1, 1]} : vector<32x32xbf16> to vector<8x32xbf16>
    %cst_28 = arith.constant dense<0.000000e+00> : vector<8x32xf32>
    %67 = tpu.matmul %65, %66, %cst_28 {dimension_numbers = #tpu.dot_dimension_numbers<[1], [0], [0], [1], [0, 0, 1, 1], [], []>} : vector<8x8xbf16>, vector<8x32xbf16>, vector<8x32xf32> -> vector<8x32xf32>
    %68 = arith.addf %45, %67 : vector<8x32xf32>
    %69 = vector.extract_strided_slice %16 {offsets = [0, 16], sizes = [8, 8], strides = [1, 1]} : vector<8x32xf32> to vector<8x8xf32>
    %70 = arith.truncf %69 : vector<8x8xf32> to vector<8x8xbf16>
    %71 = vector.extract_strided_slice %20 {offsets = [0, 16], sizes = [12, 8], strides = [1, 1]} : vector<12x32xf32> to vector<12x8xf32>
    %72 = arith.truncf %71 : vector<12x8xf32> to vector<12x8xbf16>
    %73 = vector.extract_strided_slice %21 {offsets = [0, 16], sizes = [12, 8], strides = [1, 1]} : vector<12x32xf32> to vector<12x8xf32>
    %74 = arith.truncf %73 : vector<12x8xf32> to vector<12x8xbf16>
    %cst_29 = arith.constant dense<0.000000e+00> : vector<8x12xf32>
    %75 = tpu.matmul %70, %72, %cst_29 {dimension_numbers = #tpu.dot_dimension_numbers<[1], [1], [0], [0], [0, 0, 1, 0], [], []>} : vector<8x8xbf16>, vector<12x8xbf16>, vector<8x12xf32> -> vector<8x12xf32>
    %cst_30 = arith.constant dense<0xFF800000> : vector<8xf32>
    %76 = vector.multi_reduction <maximumf>, %75, %cst_30 [1] : vector<8x12xf32> to vector<8xf32>
    %77 = vector.shape_cast %76 : vector<8xf32> to vector<8x1xf32>
    %78 = vector.broadcast %77 : vector<8x1xf32> to vector<8x12xf32>
    %79 = arith.subf %75, %78 : vector<8x12xf32>
    %80 = math.exp %79 : vector<8x12xf32>
    %cst_31 = arith.constant dense<0.000000e+00> : vector<8xf32>
    %81 = vector.multi_reduction <add>, %80, %cst_31 [1] : vector<8x12xf32> to vector<8xf32>
    %82 = vector.shape_cast %81 : vector<8xf32> to vector<8x1xf32>
    %83 = arith.truncf %80 : vector<8x12xf32> to vector<8x12xbf16>
    %cst_32 = arith.constant dense<0.000000e+00> : vector<8x8xf32>
    %84 = tpu.matmul %83, %74, %cst_32 {dimension_numbers = #tpu.dot_dimension_numbers<[1], [0], [0], [1], [0, 0, 1, 1], [], []>} : vector<8x12xbf16>, vector<12x8xbf16>, vector<8x8xf32> -> vector<8x8xf32>
    %85 = tpu.reciprocal %82 {approx = true} : vector<8x1xf32> -> vector<8x1xf32>
    %86 = vector.broadcast %85 : vector<8x1xf32> to vector<8x8xf32>
    %87 = arith.mulf %84, %86 : vector<8x8xf32>
    %88 = arith.truncf %87 : vector<8x8xf32> to vector<8x8xbf16>
    %89 = vector.extract_strided_slice %2 {offsets = [16, 0], sizes = [8, 32], strides = [1, 1]} : vector<32x32xbf16> to vector<8x32xbf16>
    %cst_33 = arith.constant dense<0.000000e+00> : vector<8x32xf32>
    %90 = tpu.matmul %88, %89, %cst_33 {dimension_numbers = #tpu.dot_dimension_numbers<[1], [0], [0], [1], [0, 0, 1, 1], [], []>} : vector<8x8xbf16>, vector<8x32xbf16>, vector<8x32xf32> -> vector<8x32xf32>
    %91 = arith.addf %68, %90 : vector<8x32xf32>
    %92 = vector.extract_strided_slice %16 {offsets = [0, 24], sizes = [8, 8], strides = [1, 1]} : vector<8x32xf32> to vector<8x8xf32>
    %93 = arith.truncf %92 : vector<8x8xf32> to vector<8x8xbf16>
    %94 = vector.extract_strided_slice %20 {offsets = [0, 24], sizes = [12, 8], strides = [1, 1]} : vector<12x32xf32> to vector<12x8xf32>
    %95 = arith.truncf %94 : vector<12x8xf32> to vector<12x8xbf16>
    %96 = vector.extract_strided_slice %21 {offsets = [0, 24], sizes = [12, 8], strides = [1, 1]} : vector<12x32xf32> to vector<12x8xf32>
    %97 = arith.truncf %96 : vector<12x8xf32> to vector<12x8xbf16>
    %cst_34 = arith.constant dense<0.000000e+00> : vector<8x12xf32>
    %98 = tpu.matmul %93, %95, %cst_34 {dimension_numbers = #tpu.dot_dimension_numbers<[1], [1], [0], [0], [0, 0, 1, 0], [], []>} : vector<8x8xbf16>, vector<12x8xbf16>, vector<8x12xf32> -> vector<8x12xf32>
    %cst_35 = arith.constant dense<0xFF800000> : vector<8xf32>
    %99 = vector.multi_reduction <maximumf>, %98, %cst_35 [1] : vector<8x12xf32> to vector<8xf32>
    %100 = vector.shape_cast %99 : vector<8xf32> to vector<8x1xf32>
    %101 = vector.broadcast %100 : vector<8x1xf32> to vector<8x12xf32>
    %102 = arith.subf %98, %101 : vector<8x12xf32>
    %103 = math.exp %102 : vector<8x12xf32>
    %cst_36 = arith.constant dense<0.000000e+00> : vector<8xf32>
    %104 = vector.multi_reduction <add>, %103, %cst_36 [1] : vector<8x12xf32> to vector<8xf32>
    %105 = vector.shape_cast %104 : vector<8xf32> to vector<8x1xf32>
    %106 = arith.truncf %103 : vector<8x12xf32> to vector<8x12xbf16>
    %cst_37 = arith.constant dense<0.000000e+00> : vector<8x8xf32>
    %107 = tpu.matmul %106, %97, %cst_37 {dimension_numbers = #tpu.dot_dimension_numbers<[1], [0], [0], [1], [0, 0, 1, 1], [], []>} : vector<8x12xbf16>, vector<12x8xbf16>, vector<8x8xf32> -> vector<8x8xf32>
    %108 = tpu.reciprocal %105 {approx = true} : vector<8x1xf32> -> vector<8x1xf32>
    %109 = vector.broadcast %108 : vector<8x1xf32> to vector<8x8xf32>
    %110 = arith.mulf %107, %109 : vector<8x8xf32>
    %111 = arith.truncf %110 : vector<8x8xf32> to vector<8x8xbf16>
    %112 = vector.extract_strided_slice %2 {offsets = [24, 0], sizes = [8, 32], strides = [1, 1]} : vector<32x32xbf16> to vector<8x32xbf16>
    %cst_38 = arith.constant dense<0.000000e+00> : vector<8x32xf32>
    %113 = tpu.matmul %111, %112, %cst_38 {dimension_numbers = #tpu.dot_dimension_numbers<[1], [0], [0], [1], [0, 0, 1, 1], [], []>} : vector<8x8xbf16>, vector<8x32xbf16>, vector<8x32xf32> -> vector<8x32xf32>
    %114 = arith.addf %91, %113 : vector<8x32xf32>
    %115 = vector.broadcast %5 : vector<1x32xf32> to vector<8x32xf32>
    %116 = arith.addf %114, %115 : vector<8x32xf32>
    %c0_39 = arith.constant 0 : index
    %c0_40 = arith.constant 0 : index
    %c0_41 = arith.constant 0 : index
    %117 = vector.load %arg9[%c0_39, %c0_40, %c0_41] : memref<2x8x32xf32, #tpu.memory_space<vmem>>, vector<1x8x32xf32>
    %118 = vector.shape_cast %117 : vector<1x8x32xf32> to vector<8x32xf32>
    %119 = vector.shape_cast %116 : vector<8x32xf32> to vector<1x8x32xf32>
    tpu.vector_store %arg9[%c0_39, %c0_40, %c0_41], %119 {strides = array<i32>} : memref<2x8x32xf32, #tpu.memory_space<vmem>>, vector<1x8x32xf32>,
    %120 = vector.extract_strided_slice %6 {offsets = [0, 1, 0], sizes = [8, 1, 32], strides = [1, 1, 1]} : vector<8x2x32xf32> to vector<8x1x32xf32>
    %121 = vector.shape_cast %120 : vector<8x1x32xf32> to vector<8x32xf32>
    %122 = arith.truncf %121 : vector<8x32xf32> to vector<8x32xbf16>
    %123 = vector.extract_strided_slice %7 {offsets = [0, 1, 0], sizes = [12, 1, 32], strides = [1, 1, 1]} : vector<12x2x32xf32> to vector<12x1x32xf32>
    %124 = vector.shape_cast %123 : vector<12x1x32xf32> to vector<12x32xf32>
    %125 = arith.truncf %124 : vector<12x32xf32> to vector<12x32xbf16>
    %cst_42 = arith.constant dense<0.000000e+00> : vector<8x32xf32>
    %126 = tpu.matmul %122, %0, %cst_42 {dimension_numbers = #tpu.dot_dimension_numbers<[1], [0], [0], [1], [0, 0, 1, 1], [], []>} : vector<8x32xbf16>, vector<32x32xbf16>, vector<8x32xf32> -> vector<8x32xf32>
    %127 = vector.broadcast %3 : vector<1x32xf32> to vector<8x32xf32>
    %128 = arith.addf %126, %127 : vector<8x32xf32>
    %cst_43 = arith.constant dense<0.000000e+00> : vector<12x64xf32>
    %129 = tpu.matmul %125, %1, %cst_43 {dimension_numbers = #tpu.dot_dimension_numbers<[1], [0], [0], [1], [0, 0, 1, 1], [], []>} : vector<12x32xbf16>, vector<32x64xbf16>, vector<12x64xf32> -> vector<12x64xf32>
    %130 = vector.broadcast %4 : vector<1x64xf32> to vector<12x64xf32>
    %131 = arith.addf %129, %130 : vector<12x64xf32>
    %132 = vector.extract_strided_slice %131 {offsets = [0, 0], sizes = [12, 32], strides = [1, 1]} : vector<12x64xf32> to vector<12x32xf32>
    %133 = vector.extract_strided_slice %131 {offsets = [0, 32], sizes = [12, 32], strides = [1, 1]} : vector<12x64xf32> to vector<12x32xf32>
    %cst_44 = arith.constant 0.000000e+00 : f32
    %134 = vector.broadcast %cst_44 : f32 to vector<8x32xf32>
    %135 = vector.extract_strided_slice %128 {offsets = [0, 0], sizes = [8, 8], strides = [1, 1]} : vector<8x32xf32> to vector<8x8xf32>
    %136 = arith.truncf %135 : vector<8x8xf32> to vector<8x8xbf16>
    %137 = vector.extract_strided_slice %132 {offsets = [0, 0], sizes = [12, 8], strides = [1, 1]} : vector<12x32xf32> to vector<12x8xf32>
    %138 = arith.truncf %137 : vector<12x8xf32> to vector<12x8xbf16>
    %139 = vector.extract_strided_slice %133 {offsets = [0, 0], sizes = [12, 8], strides = [1, 1]} : vector<12x32xf32> to vector<12x8xf32>
    %140 = arith.truncf %139 : vector<12x8xf32> to vector<12x8xbf16>
    %cst_45 = arith.constant dense<0.000000e+00> : vector<8x12xf32>
    %141 = tpu.matmul %136, %138, %cst_45 {dimension_numbers = #tpu.dot_dimension_numbers<[1], [1], [0], [0], [0, 0, 1, 0], [], []>} : vector<8x8xbf16>, vector<12x8xbf16>, vector<8x12xf32> -> vector<8x12xf32>
    %cst_46 = arith.constant dense<0xFF800000> : vector<8xf32>
    %142 = vector.multi_reduction <maximumf>, %141, %cst_46 [1] : vector<8x12xf32> to vector<8xf32>
    %143 = vector.shape_cast %142 : vector<8xf32> to vector<8x1xf32>
    %144 = vector.broadcast %143 : vector<8x1xf32> to vector<8x12xf32>
    %145 = arith.subf %141, %144 : vector<8x12xf32>
    %146 = math.exp %145 : vector<8x12xf32>
    %cst_47 = arith.constant dense<0.000000e+00> : vector<8xf32>
    %147 = vector.multi_reduction <add>, %146, %cst_47 [1] : vector<8x12xf32> to vector<8xf32>
    %148 = vector.shape_cast %147 : vector<8xf32> to vector<8x1xf32>
    %149 = arith.truncf %146 : vector<8x12xf32> to vector<8x12xbf16>
    %cst_48 = arith.constant dense<0.000000e+00> : vector<8x8xf32>
    %150 = tpu.matmul %149, %140, %cst_48 {dimension_numbers = #tpu.dot_dimension_numbers<[1], [0], [0], [1], [0, 0, 1, 1], [], []>} : vector<8x12xbf16>, vector<12x8xbf16>, vector<8x8xf32> -> vector<8x8xf32>
    %151 = tpu.reciprocal %148 {approx = true} : vector<8x1xf32> -> vector<8x1xf32>
    %152 = vector.broadcast %151 : vector<8x1xf32> to vector<8x8xf32>
    %153 = arith.mulf %150, %152 : vector<8x8xf32>
    %154 = arith.truncf %153 : vector<8x8xf32> to vector<8x8xbf16>
    %155 = vector.extract_strided_slice %2 {offsets = [0, 0], sizes = [8, 32], strides = [1, 1]} : vector<32x32xbf16> to vector<8x32xbf16>
    %cst_49 = arith.constant dense<0.000000e+00> : vector<8x32xf32>
    %156 = tpu.matmul %154, %155, %cst_49 {dimension_numbers = #tpu.dot_dimension_numbers<[1], [0], [0], [1], [0, 0, 1, 1], [], []>} : vector<8x8xbf16>, vector<8x32xbf16>, vector<8x32xf32> -> vector<8x32xf32>
    %157 = arith.addf %134, %156 : vector<8x32xf32>
    %158 = vector.extract_strided_slice %128 {offsets = [0, 8], sizes = [8, 8], strides = [1, 1]} : vector<8x32xf32> to vector<8x8xf32>
    %159 = arith.truncf %158 : vector<8x8xf32> to vector<8x8xbf16>
    %160 = vector.extract_strided_slice %132 {offsets = [0, 8], sizes = [12, 8], strides = [1, 1]} : vector<12x32xf32> to vector<12x8xf32>
    %161 = arith.truncf %160 : vector<12x8xf32> to vector<12x8xbf16>
    %162 = vector.extract_strided_slice %133 {offsets = [0, 8], sizes = [12, 8], strides = [1, 1]} : vector<12x32xf32> to vector<12x8xf32>
    %163 = arith.truncf %162 : vector<12x8xf32> to vector<12x8xbf16>
    %cst_50 = arith.constant dense<0.000000e+00> : vector<8x12xf32>
    %164 = tpu.matmul %159, %161, %cst_50 {dimension_numbers = #tpu.dot_dimension_numbers<[1], [1], [0], [0], [0, 0, 1, 0], [], []>} : vector<8x8xbf16>, vector<12x8xbf16>, vector<8x12xf32> -> vector<8x12xf32>
    %cst_51 = arith.constant dense<0xFF800000> : vector<8xf32>
    %165 = vector.multi_reduction <maximumf>, %164, %cst_51 [1] : vector<8x12xf32> to vector<8xf32>
    %166 = vector.shape_cast %165 : vector<8xf32> to vector<8x1xf32>
    %167 = vector.broadcast %166 : vector<8x1xf32> to vector<8x12xf32>
    %168 = arith.subf %164, %167 : vector<8x12xf32>
    %169 = math.exp %168 : vector<8x12xf32>
    %cst_52 = arith.constant dense<0.000000e+00> : vector<8xf32>
    %170 = vector.multi_reduction <add>, %169, %cst_52 [1] : vector<8x12xf32> to vector<8xf32>
    %171 = vector.shape_cast %170 : vector<8xf32> to vector<8x1xf32>
    %172 = arith.truncf %169 : vector<8x12xf32> to vector<8x12xbf16>
    %cst_53 = arith.constant dense<0.000000e+00> : vector<8x8xf32>
    %173 = tpu.matmul %172, %163, %cst_53 {dimension_numbers = #tpu.dot_dimension_numbers<[1], [0], [0], [1], [0, 0, 1, 1], [], []>} : vector<8x12xbf16>, vector<12x8xbf16>, vector<8x8xf32> -> vector<8x8xf32>
    %174 = tpu.reciprocal %171 {approx = true} : vector<8x1xf32> -> vector<8x1xf32>
    %175 = vector.broadcast %174 : vector<8x1xf32> to vector<8x8xf32>
    %176 = arith.mulf %173, %175 : vector<8x8xf32>
    %177 = arith.truncf %176 : vector<8x8xf32> to vector<8x8xbf16>
    %178 = vector.extract_strided_slice %2 {offsets = [8, 0], sizes = [8, 32], strides = [1, 1]} : vector<32x32xbf16> to vector<8x32xbf16>
    %cst_54 = arith.constant dense<0.000000e+00> : vector<8x32xf32>
    %179 = tpu.matmul %177, %178, %cst_54 {dimension_numbers = #tpu.dot_dimension_numbers<[1], [0], [0], [1], [0, 0, 1, 1], [], []>} : vector<8x8xbf16>, vector<8x32xbf16>, vector<8x32xf32> -> vector<8x32xf32>
    %180 = arith.addf %157, %179 : vector<8x32xf32>
    %181 = vector.extract_strided_slice %128 {offsets = [0, 16], sizes = [8, 8], strides = [1, 1]} : vector<8x32xf32> to vector<8x8xf32>
    %182 = arith.truncf %181 : vector<8x8xf32> to vector<8x8xbf16>
    %183 = vector.extract_strided_slice %132 {offsets = [0, 16], sizes = [12, 8], strides = [1, 1]} : vector<12x32xf32> to vector<12x8xf32>
    %184 = arith.truncf %183 : vector<12x8xf32> to vector<12x8xbf16>
    %185 = vector.extract_strided_slice %133 {offsets = [0, 16], sizes = [12, 8], strides = [1, 1]} : vector<12x32xf32> to vector<12x8xf32>
    %186 = arith.truncf %185 : vector<12x8xf32> to vector<12x8xbf16>
    %cst_55 = arith.constant dense<0.000000e+00> : vector<8x12xf32>
    %187 = tpu.matmul %182, %184, %cst_55 {dimension_numbers = #tpu.dot_dimension_numbers<[1], [1], [0], [0], [0, 0, 1, 0], [], []>} : vector<8x8xbf16>, vector<12x8xbf16>, vector<8x12xf32> -> vector<8x12xf32>
    %cst_56 = arith.constant dense<0xFF800000> : vector<8xf32>
    %188 = vector.multi_reduction <maximumf>, %187, %cst_56 [1] : vector<8x12xf32> to vector<8xf32>
    %189 = vector.shape_cast %188 : vector<8xf32> to vector<8x1xf32>
    %190 = vector.broadcast %189 : vector<8x1xf32> to vector<8x12xf32>
    %191 = arith.subf %187, %190 : vector<8x12xf32>
    %192 = math.exp %191 : vector<8x12xf32>
    %cst_57 = arith.constant dense<0.000000e+00> : vector<8xf32>
    %193 = vector.multi_reduction <add>, %192, %cst_57 [1] : vector<8x12xf32> to vector<8xf32>
    %194 = vector.shape_cast %193 : vector<8xf32> to vector<8x1xf32>
    %195 = arith.truncf %192 : vector<8x12xf32> to vector<8x12xbf16>
    %cst_58 = arith.constant dense<0.000000e+00> : vector<8x8xf32>
    %196 = tpu.matmul %195, %186, %cst_58 {dimension_numbers = #tpu.dot_dimension_numbers<[1], [0], [0], [1], [0, 0, 1, 1], [], []>} : vector<8x12xbf16>, vector<12x8xbf16>, vector<8x8xf32> -> vector<8x8xf32>
    %197 = tpu.reciprocal %194 {approx = true} : vector<8x1xf32> -> vector<8x1xf32>
    %198 = vector.broadcast %197 : vector<8x1xf32> to vector<8x8xf32>
    %199 = arith.mulf %196, %198 : vector<8x8xf32>
    %200 = arith.truncf %199 : vector<8x8xf32> to vector<8x8xbf16>
    %201 = vector.extract_strided_slice %2 {offsets = [16, 0], sizes = [8, 32], strides = [1, 1]} : vector<32x32xbf16> to vector<8x32xbf16>
    %cst_59 = arith.constant dense<0.000000e+00> : vector<8x32xf32>
    %202 = tpu.matmul %200, %201, %cst_59 {dimension_numbers = #tpu.dot_dimension_numbers<[1], [0], [0], [1], [0, 0, 1, 1], [], []>} : vector<8x8xbf16>, vector<8x32xbf16>, vector<8x32xf32> -> vector<8x32xf32>
    %203 = arith.addf %180, %202 : vector<8x32xf32>
    %204 = vector.extract_strided_slice %128 {offsets = [0, 24], sizes = [8, 8], strides = [1, 1]} : vector<8x32xf32> to vector<8x8xf32>
    %205 = arith.truncf %204 : vector<8x8xf32> to vector<8x8xbf16>
    %206 = vector.extract_strided_slice %132 {offsets = [0, 24], sizes = [12, 8], strides = [1, 1]} : vector<12x32xf32> to vector<12x8xf32>
    %207 = arith.truncf %206 : vector<12x8xf32> to vector<12x8xbf16>
    %208 = vector.extract_strided_slice %133 {offsets = [0, 24], sizes = [12, 8], strides = [1, 1]} : vector<12x32xf32> to vector<12x8xf32>
    %209 = arith.truncf %208 : vector<12x8xf32> to vector<12x8xbf16>
    %cst_60 = arith.constant dense<0.000000e+00> : vector<8x12xf32>
    %210 = tpu.matmul %205, %207, %cst_60 {dimension_numbers = #tpu.dot_dimension_numbers<[1], [1], [0], [0], [0, 0, 1, 0], [], []>} : vector<8x8xbf16>, vector<12x8xbf16>, vector<8x12xf32> -> vector<8x12xf32>
    %cst_61 = arith.constant dense<0xFF800000> : vector<8xf32>
    %211 = vector.multi_reduction <maximumf>, %210, %cst_61 [1] : vector<8x12xf32> to vector<8xf32>
    %212 = vector.shape_cast %211 : vector<8xf32> to vector<8x1xf32>
    %213 = vector.broadcast %212 : vector<8x1xf32> to vector<8x12xf32>
    %214 = arith.subf %210, %213 : vector<8x12xf32>
    %215 = math.exp %214 : vector<8x12xf32>
    %cst_62 = arith.constant dense<0.000000e+00> : vector<8xf32>
    %216 = vector.multi_reduction <add>, %215, %cst_62 [1] : vector<8x12xf32> to vector<8xf32>
    %217 = vector.shape_cast %216 : vector<8xf32> to vector<8x1xf32>
    %218 = arith.truncf %215 : vector<8x12xf32> to vector<8x12xbf16>
    %cst_63 = arith.constant dense<0.000000e+00> : vector<8x8xf32>
    %219 = tpu.matmul %218, %209, %cst_63 {dimension_numbers = #tpu.dot_dimension_numbers<[1], [0], [0], [1], [0, 0, 1, 1], [], []>} : vector<8x12xbf16>, vector<12x8xbf16>, vector<8x8xf32> -> vector<8x8xf32>
    %220 = tpu.reciprocal %217 {approx = true} : vector<8x1xf32> -> vector<8x1xf32>
    %221 = vector.broadcast %220 : vector<8x1xf32> to vector<8x8xf32>
    %222 = arith.mulf %219, %221 : vector<8x8xf32>
    %223 = arith.truncf %222 : vector<8x8xf32> to vector<8x8xbf16>
    %224 = vector.extract_strided_slice %2 {offsets = [24, 0], sizes = [8, 32], strides = [1, 1]} : vector<32x32xbf16> to vector<8x32xbf16>
    %cst_64 = arith.constant dense<0.000000e+00> : vector<8x32xf32>
    %225 = tpu.matmul %223, %224, %cst_64 {dimension_numbers = #tpu.dot_dimension_numbers<[1], [0], [0], [1], [0, 0, 1, 1], [], []>} : vector<8x8xbf16>, vector<8x32xbf16>, vector<8x32xf32> -> vector<8x32xf32>
    %226 = arith.addf %203, %225 : vector<8x32xf32>
    %227 = vector.broadcast %5 : vector<1x32xf32> to vector<8x32xf32>
    %228 = arith.addf %226, %227 : vector<8x32xf32>
    %c1 = arith.constant 1 : index
    %c0_65 = arith.constant 0 : index
    %c0_66 = arith.constant 0 : index
    %229 = vector.load %arg9[%c1, %c0_65, %c0_66] : memref<2x8x32xf32, #tpu.memory_space<vmem>>, vector<1x8x32xf32>
    %230 = vector.shape_cast %229 : vector<1x8x32xf32> to vector<8x32xf32>
    %231 = vector.shape_cast %228 : vector<8x32xf32> to vector<1x8x32xf32>
    tpu.vector_store %arg9[%c1, %c0_65, %c0_66], %231 {strides = array<i32>} : memref<2x8x32xf32, #tpu.memory_space<vmem>>, vector<1x8x32xf32>,
    return
  }
  func.func @transform_0(%arg0: i32) -> (i32, i32, i32) {
    %c0_i32 = arith.constant 0 : i32
    %c0_i32_0 = arith.constant 0 : i32
    %c0_i32_1 = arith.constant 0 : i32
    %c0_i32_2 = arith.constant 0 : i32
    return %c0_i32, %c0_i32_0, %c0_i32_1 : i32, i32, i32
  }
  func.func @transform_1(%arg0: i32) -> (i32, i32, i32) {
    %c0_i32 = arith.constant 0 : i32
    %c0_i32_0 = arith.constant 0 : i32
    %c0_i32_1 = arith.constant 0 : i32
    %c0_i32_2 = arith.constant 0 : i32
    return %c0_i32, %c0_i32_0, %c0_i32_1 : i32, i32, i32
  }
  func.func @transform_2(%arg0: i32) -> (i32, i32) {
    %c0_i32 = arith.constant 0 : i32
    %c0_i32_0 = arith.constant 0 : i32
    %c0_i32_1 = arith.constant 0 : i32
    return %c0_i32, %c0_i32_0 : i32, i32
  }
  func.func @transform_3(%arg0: i32) -> (i32, i32) {
    %c0_i32 = arith.constant 0 : i32
    %c0_i32_0 = arith.constant 0 : i32
    %c0_i32_1 = arith.constant 0 : i32
    return %c0_i32, %c0_i32_0 : i32, i32
  }
  func.func @transform_4(%arg0: i32) -> (i32, i32) {
    %c0_i32 = arith.constant 0 : i32
    %c0_i32_0 = arith.constant 0 : i32
    %c0_i32_1 = arith.constant 0 : i32
    return %c0_i32, %c0_i32_0 : i32, i32
  }
  func.func @transform_5(%arg0: i32) -> (i32, i32) {
    %c0_i32 = arith.constant 0 : i32
    %c0_i32_0 = arith.constant 0 : i32
    %c0_i32_1 = arith.constant 0 : i32
    return %c0_i32, %c0_i32_0 : i32, i32
  }
  func.func @transform_6(%arg0: i32) -> (i32, i32) {
    %c0_i32 = arith.constant 0 : i32
    %c0_i32_0 = arith.constant 0 : i32
    %c0_i32_1 = arith.constant 0 : i32
    return %c0_i32, %c0_i32_0 : i32, i32
  }
  func.func @transform_7(%arg0: i32) -> (i32, i32) {
    %c0_i32 = arith.constant 0 : i32
    %c0_i32_0 = arith.constant 0 : i32
    %c0_i32_1 = arith.constant 0 : i32
    return %c0_i32, %c0_i32_0 : i32, i32
  }
  func.func @transform_8(%arg0: i32) -> (i32, i32, i32) {
    %c0_i32 = arith.constant 0 : i32
    %c0_i32_0 = arith.constant 0 : i32
    %c0_i32_1 = arith.constant 0 : i32
    %c0_i32_2 = arith.constant 0 : i32
    return %c0_i32, %c0_i32_0, %c0_i32_1 : i32, i32, i32
  }
}

</mosaic_0001>

<bundles_post_ra>
// kernel: tpu_custom_call.1
= control target key start
LH: loop header
LB: loop body
LE: loop exit
PB: predicated region body
PF: predicated region fallthrough
CT: control target
= control target key end

     0   :  { %13 = vsyncpa [#allocation3], 0  ;;  %s2699_s0 = inlined_call_operand.hbm [shape: f32[8,2,32], index: 0, kind: input, shape index: {}]   ;;  %s2700_s1 = inlined_call_operand.hbm [shape: f32[12,2,32], index: 1, kind: input, shape index: {}]   ;;  %s2701_s2 = inlined_call_operand.hbm [shape: bf16[32,32], index: 2, kind: input, shape index: {}]   ;;  %s2702_s3 = inlined_call_operand.hbm [shape: bf16[32,64], index: 3, kind: input, shape index: {}]   ;;  %s2703_s4 = inlined_call_operand.hbm [shape: bf16[32,32], index: 4, kind: input, shape index: {}]   ;;  %s2704_s5 = inlined_call_operand.vmem [shape: f32[1,32], index: 5, kind: input, shape index: {}]   ;;  %s2705_s6 = inlined_call_operand.vmem [shape: f32[1,64], index: 6, kind: input, shape index: {}]   ;;  %s2706_s7 = inlined_call_operand.vmem [shape: f32[1,32], index: 7, kind: input, shape index: {}]   ;;  %s2707_s8 = inlined_call_operand.hbm [shape: f32[2,8,32], index: 8, kind: output, shape index: {}]  }
   0x1   :  { %14 = vsyncpa [#allocation6], 0 }
   0x2   :  { %15 = vsyncpa [#allocation9], 0 }
   0x3   :  { %16 = vsyncpa [#allocation4], 0  ;;  %s2222_s27 = smov [#allocation5]  }
   0x4   :  { %s34_s28 = sshll.u32 %s2222_s27, 4  ;;  %s35_s28 = int_to_ptr.vmem [resolvable:$true] %s34_s28 }
   0x5   :  { %s2102_s29 = scalar_lea.vmem %s35_s28, 384  ;;  %p2107_p1 = scmp.lt.s32.totalorder %s35_s28, %s35_s28 }
   0x6   :  { %p2103_p0 = scmp.ne.s32.totalorder %s35_s28, %s2102_s29  ;;  %p2108_p2 = scmp.lt.s32.totalorder %s2102_s29, %s2102_s29 }
   0x8   :  { %p2109_p3 = por %p2108_p2, %p2107_p1 }
   0xa   :  { %p2110_p4 = pnand %p2109_p3, %p2103_p0 }
   0xc   :  { %2113 = shalt.err (!%p2110_p4)
}
   0xd   :  { %s2223_s30 = smov 32   ;;  %s2224_s9 = smov 2  }
   0xe   :  { %40 = dma.hbm_to_vmem [thread:$0]  %s2700_s1, 384, %s35_s28, [#allocation6], %s2223_s30, %s2223_s30, %s2224_s9  }
   0xf   :  { %s2225_s12 = smov [#allocation8]   ;;  %s2226_s14 = smov [#allocation2]  }
  0x10   :  { %s58_s13 = sshll.u32 %s2225_s12, 4  ;;  %s22_s15 = sshll.u32 %s2226_s14, 4  ;;  %s59_s13 = int_to_ptr.vmem [resolvable:$true] %s58_s13  ;;  %s23_s15 = int_to_ptr.vmem [resolvable:$true] %s22_s15 }
  0x11   :  { %s2122_s16 = scalar_lea.vmem %s59_s13, 256  ;;  %p2127_p6 = scmp.lt.s32.totalorder %s59_s13, %s59_s13 }
  0x12   :  { %p2123_p5 = scmp.ne.s32.totalorder %s59_s13, %s2122_s16  ;;  %p2128_p7 = scmp.lt.s32.totalorder %s2122_s16, %s2122_s16 }
  0x14   :  { %p2129_p8 = por %p2128_p7, %p2127_p6 }
  0x16   :  { %p2130_p9 = pnand %p2129_p8, %p2123_p5 }
  0x18   :  { %2133 = shalt.err (!%p2130_p9)
}
  0x19   :  { %s2227_s17 = smov 64   ;;  %s2228_s18 = smov 4  }
  0x1a   :  { %64 = dma.hbm_to_vmem [thread:$0]  %s2702_s3, 256, %s59_s13, [#allocation9], %s2227_s17, %s2227_s17, %s2228_s18  }
  0x1b   :  { %s2142_s1 = scalar_lea.vmem %s23_s15, 256  ;;  %p2147_p11 = scmp.lt.s32.totalorder %s23_s15, %s23_s15 }
  0x1c   :  { %p2143_p10 = scmp.ne.s32.totalorder %s23_s15, %s2142_s1  ;;  %p2148_p12 = scmp.lt.s32.totalorder %s2142_s1, %s2142_s1 }
  0x1e   :  { %p2149_p13 = por %p2148_p12, %p2147_p11 }
  0x20   :  { %p2150_p0 = pnand %p2149_p13, %p2143_p10 }
  0x22   :  { %2153 = shalt.err (!%p2150_p0)
}
  0x23   :  { %28 = dma.hbm_to_vmem [thread:$0]  %s2699_s0, 256, %s23_s15, [#allocation3], %s2223_s30, %s2223_s30, %s2224_s9  }
  0x24   :  { %s2229_s23 = smov [#allocation7]   ;;  %s2230_s25 = smov [#allocation10]  }
  0x25   :  { %s46_s24 = sshll.u32 %s2229_s23, 4  ;;  %s70_s26 = sshll.u32 %s2230_s25, 4  ;;  %s47_s24 = int_to_ptr.vmem [resolvable:$true] %s46_s24  ;;  %s71_s26 = int_to_ptr.vmem [resolvable:$true] %s70_s26 }
  0x26   :  { %s2162_s27 = scalar_lea.vmem %s47_s24, 256  ;;  %p2167_p2 = scmp.lt.s32.totalorder %s47_s24, %s47_s24 }
  0x27   :  { %p2163_p1 = scmp.ne.s32.totalorder %s47_s24, %s2162_s27  ;;  %p2168_p3 = scmp.lt.s32.totalorder %s2162_s27, %s2162_s27 }
  0x29   :  { %p2169_p4 = por %p2168_p3, %p2167_p2 }
  0x2b   :  { %p2170_p5 = pnand %p2169_p4, %p2163_p1 }
  0x2d   :  { %2173 = shalt.err (!%p2170_p5)
}
  0x2e   :  { %52 = dma.hbm_to_vmem [thread:$0]  %s2701_s2, 256, %s47_s24, [#allocation6], %s2227_s17, %s2227_s17, %s2228_s18  }
  0x2f   :  { %s2182_s0 = scalar_lea.vmem %s71_s26, 256  ;;  %p2187_p7 = scmp.lt.s32.totalorder %s71_s26, %s71_s26 }
  0x30   :  { %p2183_p6 = scmp.ne.s32.totalorder %s71_s26, %s2182_s0  ;;  %p2188_p8 = scmp.lt.s32.totalorder %s2182_s0, %s2182_s0 }
  0x32   :  { %p2189_p9 = por %p2188_p8, %p2187_p7 }
  0x34   :  { %p2190_p10 = pnand %p2189_p9, %p2183_p6 }
  0x36   :  { %2193 = shalt.err (!%p2190_p10)
}
  0x37   :  { %76 = dma.hbm_to_vmem [thread:$0]  %s2703_s4, 256, %s71_s26, [#allocation9], %s2227_s17, %s2227_s17, %s2228_s18  }
  0x38   :  { %2214 = dma.done.wait [#allocation3], 256  }
  0x39   :  { %2215 = vsyncadd [#allocation3], 4294967040 }
  0x3a   :  { %2216 = dma.done.wait [#allocation6], 640  }
  0x3b   :  { %2217 = vsyncadd [#allocation6], 4294966656 }
  0x3c   :  { %2218 = dma.done.wait [#allocation9], 512  }
  0x3d   :  { %2219 = vsyncadd [#allocation9], 4294966784  ;;  %v2231_v0 = vmov 0.0   ;;  %vm2232_vm0 = vmmov 0   ;;  %v2318_v1 = vld [vmem:[#allocation8 + $0x8] sm:$0xff]   ;;  %v2320_v2 = vld [vmem:[#allocation8] sm:$0xff]  }
  0x3e   :  { %1869 = vmatprep.subr.bf16.mxu1 %v2231_v0  ;;  %1861 = vmatprep.subr.bf16.mxu0 %v2231_v0  ;;  %vm177_vm1 = vcmask 1041409   ;;  %v2323_v3 = vld [vmem:[#allocation7 + $0x8] sm:$0xff]   ;;  %vm180_vm2 = vcmask 1042434   ;;  %vm183_vm3 = vcmask 1043459   ;;  %v126_v8 = vld [vmem:[#allocation5 + $0x8] sm:$0x3] }
  0x3f   :  { %1873 = vmatprep.mubr.msk.bf16.mxu1 %vm2232_vm0, %v2231_v0  ;;  %1865 = vmatprep.mubr.msk.bf16.mxu0 %vm2232_vm0, %v2231_v0  ;;  %v122_v4 = vld [vmem:[#allocation5] sm:$0x3]  ;;  %v123_v5 = vld [vmem:[#allocation5 + $0x2] sm:$0x3]  ;;  %v124_v6 = vld [vmem:[#allocation5 + $0x4] sm:$0x3]  ;;  %v146_v17 = vpack.c.bf16 %v126_v8, %v126_v8 }
  0x40   :  { %1870 = vmatpush3.bf16.msra.mxu1 %v2318_v1  ;;  %1862 = vmatpush3.bf16.msra.mxu0 %v2323_v3  ;;  %v125_v7 = vld [vmem:[#allocation5 + $0x6] sm:$0x3]  ;;  %v127_v9 = vld [vmem:[#allocation5 + $0xa] sm:$0x3]  ;;  %v142_v10 = vpack.c.bf16 %v122_v4, %v122_v4  ;;  %v143_v11 = vpack.c.bf16 %v123_v5, %v123_v5  ;;  %v144_v12 = vpack.c.bf16 %v124_v6, %v124_v6  ;;  %v128_v13 = vld [vmem:[#allocation5 + $0xc] sm:$0x3] }
  0x41   :  { %1871 = vmatprep.subr.bf16.mxu1 %v2231_v0  ;;  %v129_v14 = vld [vmem:[#allocation5 + $0xe] sm:$0x3]  ;;  %v130_v15 = vld [vmem:[#allocation5 + $0x10] sm:$0x3]  ;;  %v145_v16 = vpack.c.bf16 %v125_v7, %v125_v7  ;;  %v147_v18 = vpack.c.bf16 %v127_v9, %v127_v9  ;;  %1863 = vmatprep.subr.bf16.mxu0 %v2231_v0  ;;  %v131_v19 = vld [vmem:[#allocation5 + $0x12] sm:$0x3]  ;;  %v148_v22 = vpack.c.bf16 %v128_v13, %v128_v13  ;;  %v2340_v33 = vunpack.c.l.b16 %v146_v17 }
  0x42   :  { %v132_v20 = vld [vmem:[#allocation5 + $0x14] sm:$0x3]  ;;  %v133_v21 = vld [vmem:[#allocation5 + $0x16] sm:$0x3]  ;;  %v149_v23 = vpack.c.bf16 %v129_v14, %v129_v14  ;;  %v150_v24 = vpack.c.bf16 %v130_v15, %v130_v15  ;;  %v2329_v25 = vunpack.c.l.b16 %v142_v10  ;;  %v151_v26 = vpack.c.bf16 %v131_v19, %v131_v19  ;;  %v2333_v30 = vld [vmem:[#allocation7] sm:$0xff]   ;;  %s2233_s9 = smov 120  }
  0x43   :  { %v152_v27 = vpack.c.bf16 %v132_v20, %v132_v20  ;;  %v153_v28 = vpack.c.bf16 %v133_v21, %v133_v21  ;;  %v2331_v29 = vunpack.c.l.b16 %v143_v11  ;;  %v2336_v31 = vunpack.c.l.b16 %v144_v12  ;;  %v114_v55 = vld [vmem:[#allocation2] sm:$0x3]  ;;  %v115_v58 = vld [vmem:[#allocation2 + $0x2] sm:$0x3]  ;;  %v116_v59 = vld [vmem:[#allocation2 + $0x4] sm:$0x3] }
  0x44   :  { %1872 = vmatpush3.bf16.msra.mxu1 %v2320_v2  ;;  %v2338_v32 = vunpack.c.l.b16 %v145_v16  ;;  %v2342_v34 = vunpack.c.l.b16 %v147_v18  ;;  %v2344_v35 = vunpack.c.l.b16 %v148_v22  ;;  %v2346_v36 = vunpack.c.l.b16 %v149_v23  ;;  %1864 = vmatpush3.bf16.msra.mxu0 %v2333_v30  ;;  %v117_v60 = vld [vmem:[#allocation2 + $0x6] sm:$0x3]  ;;  %v118_v63 = vld [vmem:[#allocation2 + $0x8] sm:$0x3]  ;;  %v119_v4 = vld [vmem:[#allocation2 + $0xa] sm:$0x3] }
  0x45   :  { %1883 = vmatprep.subr.bf16.mxu1 %v2231_v0  ;;  %v2348_v37 = vunpack.c.l.b16 %v150_v24  ;;  %v2350_v38 = vunpack.c.l.b16 %v151_v26  ;;  %v2353_v39 = vunpack.c.l.b16 %v152_v27  ;;  %v2355_v40 = vunpack.c.l.b16 %v153_v28  ;;  %1877 = vmatprep.subr.bf16.mxu0 %v2231_v0  ;;  %v120_v5 = vld [vmem:[#allocation2 + $0xc] sm:$0x3]  ;;  %v121_v7 = vld [vmem:[#allocation2 + $0xe] sm:$0x3]  ;;  %s2234_s11 = smov 96   ;;  %s2236_s12 = smov 112  }
  0x46   :  { %v284_v41 = vrot.slane %v2331_v29, 7  ;;  %v286_v42 = vrot.slane %v2336_v31, 6  ;;  %vm186_vm4 = vcmask 1044484   ;;  %vm189_vm5 = vcmask 1045509   ;;  %s2237_s13 = smov 104   ;;  %s2238_s14 = smov 80  }
  0x47   :  { %v288_v43 = vrot.slane %v2338_v32, 5  ;;  %v290_v44 = vrot.slane %v2340_v33, 4  ;;  %v292_v46 = vrot.slane %v2342_v34, 3  ;;  %v298_v47 = vrot.slane %v2350_v38, 7  ;;  %s2239_s15 = smov 72  }
  0x48   :  { %v285_v45 = vsel %vm177_vm1, %v284_v41, %v2329_v25  ;;  %v300_v48 = vrot.slane %v2353_v39, 6  ;;  %vm192_vm6 = vcmask 1046534   ;;  %v294_v50 = vrot.slane %v2344_v35, 2 }
  0x49   :  { %v287_v49 = vsel %vm180_vm2, %v286_v42, %v285_v45  ;;  %v302_v51 = vrot.slane %v2355_v40, 5  ;;  %vm195_vm7 = vcmask 1047559   ;;  %v296_v53 = vrot.slane %v2346_v36, 1 }
  0x4a   :  { %v289_v52 = vsel %vm183_vm3, %v288_v43, %v287_v49  ;;  %v299_v54 = vsel %vm177_vm1, %v298_v47, %v2348_v37  ;;  %vm210_vm8 = vcmask 261120   ;;  %v134_v8 = vpack.c.bf16 %v114_v55, %v114_v55  ;;  %v2420_v55 = vld [vmem:[%s2705_s6] ss:$0 sm:$0xff] }
  0x4b   :  { %v291_v56 = vsel %vm186_vm4, %v290_v44, %v289_v52  ;;  %v301_v57 = vsel %vm180_vm2, %v300_v48, %v299_v54  ;;  %v135_v10 = vpack.c.bf16 %v115_v58, %v115_v58  ;;  %v136_v11 = vpack.c.bf16 %v116_v59, %v116_v59 }
  0x4c   :  { %v293_v61 = vsel %vm189_vm5, %v292_v46, %v291_v56  ;;  %v303_v62 = vsel %vm183_vm3, %v302_v51, %v301_v57  ;;  %v137_v12 = vpack.c.bf16 %v117_v60, %v117_v60  ;;  %v138_v14 = vpack.c.bf16 %v118_v63, %v118_v63  ;;  %v2433_v63 = vld [vmem:[%s2704_s5] ss:$0 sm:$0xff]  ;;  %s2235_s5 = smov 88  }
  0x4d   :  { %v295_v6 = vsel %vm192_vm6, %v294_v50, %v293_v61  ;;  %v139_v15 = vpack.c.bf16 %v119_v4, %v119_v4  ;;  %v140_v16 = vpack.c.bf16 %v120_v5, %v120_v5  ;;  %v141_v17 = vpack.c.bf16 %v121_v7, %v121_v7 }
  0x4e   :  { %v297_v9 = vsel %vm195_vm7, %v296_v53, %v295_v6  ;;  %v2380_v18 = vunpack.c.l.b16 %v134_v8  ;;  %v2382_v19 = vunpack.c.l.b16 %v135_v10  ;;  %v2384_v20 = vunpack.c.l.b16 %v136_v11 }
  0x4f   :  { %v304_v13 = vpack.c.b16 %v303_v62, %v297_v9  ;;  %v2387_v21 = vunpack.c.l.b16 %v137_v12  ;;  %v2389_v22 = vunpack.c.l.b16 %v138_v14  ;;  %v2391_v23 = vunpack.c.l.b16 %v139_v15 }
  0x50   :  { %v2393_v24 = vunpack.c.l.b16 %v140_v16  ;;  %v2395_v26 = vunpack.c.l.b16 %v141_v17  ;;  %v176_v27 = vrot.slane %v2382_v19, 7  ;;  %v179_v28 = vrot.slane %v2384_v20, 6 }
  0x51   :  { %1874 = vmatmul.mubr.msk.bf16.vlgmr.msra.gmra.mxu1 %vm210_vm8, %v304_v13  ;;  %v182_v41 = vrot.slane %v2387_v21, 5  ;;  %v185_v42 = vrot.slane %v2389_v22, 4  ;;  %v188_v44 = vrot.slane %v2391_v23, 3  ;;  %vm363_vm9 = vcmask 64512  }
  0x52   :  { %1885 = vmatprep.mubr.msk.bf16.mxu1 %vm2232_vm0, %v2231_v0  ;;  %v178_v43 = vsel %vm177_vm1, %v176_v27, %v2380_v18  ;;  %v191_v46 = vrot.slane %v2393_v24, 2  ;;  %v194_v48 = vrot.slane %v2395_v26, 1  ;;  %vm427_vm10 = vcmask 1045504  }
  0x53   :  { %v181_v45 = vsel %vm180_vm2, %v179_v28, %v178_v43  ;;  %vm410_vm11 = vcmask 97280   ;;  %vm589_vm12 = vcmask 1043456  }
  0x54   :  { %v184_v47 = vsel %vm183_vm3, %v182_v41, %v181_v45 }
  0x55   :  { %v187_v49 = vsel %vm186_vm4, %v185_v42, %v184_v47 }
  0x56   :  { %v190_v50 = vsel %vm189_vm5, %v188_v44, %v187_v49 }
  0x57   :  { %v193_v51 = vsel %vm192_vm6, %v191_v46, %v190_v50 }
  0x58   :  { %v196_v52 = vsel %vm195_vm7, %v194_v48, %v193_v51 }
  0x59   :  { %v197_v53 = vpack.c.b16 %v196_v52, %v196_v52 }
  0x5b   :  { %1866 = vmatmul.mubr.msk.bf16.vlgmr.msra.gmra.mxu0 %vm210_vm8, %v197_v53 }
  0x5c   :  { %1879 = vmatprep.mubr.msk.bf16.mxu0 %vm2232_vm0, %v2231_v0 }
 0x111   :  { %v354_v54 = vpop.f32.mrf.mxu1 }
 0x112   :  { %v355_v58 = vadd.f32 %v2420_v55, %v354_v54 }
 0x113   :  { %v1875_v56 = vpop.f32.mrf.mxu1 }
 0x115   :  { %v357_v57 = vpop.f32.mrf.mxu1 }
 0x116   :  { %v358_v59 = vadd.f32 %v2420_v55, %v357_v57 }
 0x117   :  { %v1876_v60 = vpop.f32.mrf.mxu1 }
 0x118   :  { %v2424_v61 = vpack.c.bf16 %v358_v59, %v355_v58  ;;  %v107_v58 = vld [vmem:[#allocation10] sm:$0xf] }
 0x11a   :  { %477 = vrot.lane.b32.xlu0 %v2424_v61, %s2233_s9  ;;  %v368_v62 = vsel %vm363_vm9, %v2424_v61, 0 }
 0x11b   :  { %1878 = vmatpush3.bf16.xpose.msra.mxu0 %v368_v62  ;;  %v248_v4 = vpop.f32.mrf.mxu0 }
 0x11c   :  { %1889 = vmatprep.subr.bf16.mxu0 %v2231_v0  ;;  %v249_v5 = vadd.f32 %v2433_v63, %v248_v4  ;;  %v2466_v4 = vsel %vm589_vm12, %v107_v58, 0 }
 0x11d   :  { %v1867_v6 = vpop.f32.mrf.mxu0 }
 0x11e   :  { %v361_v7 = vpack.c.bf16 %v249_v5, %v249_v5  ;;  %v108_v5 = vld [vmem:[#allocation10 + $0x4] sm:$0xf] }
 0x11f   :  { %v251_v8 = vpop.f32.mrf.mxu0  ;;  %v2474_v6 = vsel %vm589_vm12, %v108_v5, 0 }
 0x120   :  { %475 = vrot.lane.b32.xlu0 %v361_v7, %s2233_s9 }
 0x121   :  { %v1868_v9 = vpop.f32.mrf.mxu0 }
 0x122   :  { %1880 = vmatmul.mubr.msk.bf16.vlgmr.msra.gmra.mxu0 %vm363_vm9, %v361_v7 }
 0x123   :  { %1891 = vmatprep.mubr.msk.bf16.mxu0 %vm2232_vm0, %v2231_v0 }
 0x124   :  { %422 = vrot.lane.b32.xlu0 %v2424_v61, %s2234_s11 }
 0x18c   :  { %v478_v10 = vpop.permute.xlu0 %477 }
 0x18d   :  { %v483_v11 = vsel %vm363_vm9, %v478_v10, 0 }
 0x18e   :  { %1890 = vmatpush3.bf16.xpose.msra.mxu0 %v483_v11 }
 0x18f   :  { %1901 = vmatprep.subr.bf16.mxu0 %v2231_v0 }
 0x192   :  { %v476_v12 = vpop.permute.xlu0 %475 }
 0x195   :  { %1892 = vmatmul.mubr.msk.bf16.vlgmr.msra.gmra.mxu0 %vm363_vm9, %v476_v12 }
 0x196   :  { %1903 = vmatprep.mubr.msk.bf16.mxu0 %vm2232_vm0, %v2231_v0  ;;  %v423_v13 = vpop.permute.xlu0 %422  ;;  %1902 = vmatpush3.bf16.msra.mxu0 %v2474_v6 }
 0x197   :  { %v429_v14 = vsel %vm427_vm10, %v423_v13, 0  ;;  %1913 = vmatprep.subr.bf16.mxu0 %v2231_v0 }
 0x198   :  { %1884 = vmatpush3.bf16.msra.mxu1 %v429_v14 }
 0x199   :  { %1895 = vmatprep.subr.bf16.mxu1 %v2231_v0 }
 0x1e2   :  { %v404_v15 = vpop.f32.mrf.mxu0 }
 0x1e3   :  { %v411_v16 = vsel %vm410_vm11, %v404_v15, -inf }
 0x1e4   :  { %412 = vmax.xlane.f32.xlu1 %v411_v16  ;;  %v1881_v17 = vpop.f32.mrf.mxu0 }
 0x1e6   :  { %v407_v27 = vpop.f32.mrf.mxu0 }
 0x1e8   :  { %v1882_v28 = vpop.f32.mrf.mxu0 }
 0x255   :  { %v519_v41 = vpop.f32.mrf.mxu0 }
 0x256   :  { %v525_v42 = vsel %vm410_vm11, %v519_v41, -inf }
 0x257   :  { %526 = vmax.xlane.f32.xlu1 %v525_v42  ;;  %v1893_v43 = vpop.f32.mrf.mxu0 }
 0x259   :  { %v522_v44 = vpop.f32.mrf.mxu0 }
 0x25b   :  { %v1894_v45 = vpop.f32.mrf.mxu0 }
 0x268   :  { %535 = vrot.lane.b32.xlu1 %v2424_v61, %s2235_s5 }
 0x26c   :  { %681 = vrot.lane.b32.xlu1 %v2424_v61, %s2236_s12 }
 0x26d   :  { %v413_v46 = vpop.xlane.xlu1 %412 }
 0x26e   :  { %v414_v47 = vsub.f32 %v404_v15, %v413_v46 }
 0x270   :  { %v415_v48 = vmul.f32 1.442695, %v414_v47  ;;  %679 = vrot.lane.b32.xlu1 %v361_v7, %s2236_s12 }
 0x272   :  { %2062 = vpow2.f32 %v415_v48 }
 0x27f   :  { %v2063_v49 = vpop.eup %2062 }
 0x280   :  { %v420_v50 = vpack.c.bf16 %v2063_v49, %v2063_v49  ;;  %v417_v51 = vsel %vm410_vm11, %v2063_v49, 0.0 }
 0x282   :  { %1886 = vmatmul.mubr.msk.bf16.vlgmr.msra.gmra.mxu1 %vm410_vm11, %v420_v50 }
 0x283   :  { %1897 = vmatprep.mubr.msk.bf16.mxu1 %vm2232_vm0, %v2231_v0 }
 0x294   :  { %418 = vadd.xlane.f32.xlu1 %v417_v51 }
 0x2a5   :  { %837 = vrot.lane.b32.xlu1 %v361_v7, %s2237_s13 }
 0x2e0   :  { %v527_v52 = vpop.xlane.xlu1 %526 }
 0x2e1   :  { %v528_v53 = vsub.f32 %v519_v41, %v527_v52 }
 0x2e3   :  { %v529_v54 = vmul.f32 1.442695, %v528_v53 }
 0x2e4   :  { %v536_v56 = vpop.permute.xlu1 %535 }
 0x2e5   :  { %2064 = vpow2.f32 %v529_v54  ;;  %v541_v57 = vsel %vm427_vm10, %v536_v56, 0 }
 0x2e6   :  { %1896 = vmatpush3.bf16.msra.mxu1 %v541_v57 }
 0x2e7   :  { %1907 = vmatprep.subr.bf16.mxu1 %v2231_v0 }
 0x2e8   :  { %v682_v7 = vpop.permute.xlu1 %681 }
 0x2e9   :  { %v687_v45 = vsel %vm363_vm9, %v682_v7, 0 }
 0x2ec   :  { %v680_v8 = vpop.permute.xlu1 %679 }
 0x2f2   :  { %v2065_v59 = vpop.eup %2064 }
 0x2f3   :  { %v531_v60 = vsel %vm410_vm11, %v2065_v59, 0.0  ;;  %v534_v62 = vpack.c.bf16 %v2065_v59, %v2065_v59 }
 0x2f4   :  { %532 = vadd.xlane.f32.xlu0 %v531_v60 }
 0x2f5   :  { %1898 = vmatmul.mubr.msk.bf16.vlgmr.msra.gmra.mxu1 %vm410_vm11, %v534_v62 }
 0x2f6   :  { %1908 = vmatpush3.bf16.msra.mxu1 %v2466_v4  ;;  %1909 = vmatprep.mubr.msk.bf16.mxu1 %vm2232_vm0, %v2231_v0 }
 0x2f7   :  { %1919 = vmatprep.subr.bf16.mxu1 %v2231_v0 }
 0x31d   :  { %v419_v9 = vpop.xlane.xlu1 %418 }
 0x31e   :  { %2066 = vrcp.f32 %v419_v9 }
 0x32b   :  { %v2067_v10 = vpop.eup %2066 }
 0x342   :  { %v465_v11 = vpop.f32.mrf.mxu1 }
 0x343   :  { %v472_v12 = vmul.f32 %v2067_v10, %v465_v11 }
 0x344   :  { %v1887_v13 = vpop.f32.mrf.mxu1 }
 0x345   :  { %v473_v14 = vpack.c.bf16 %v472_v12, %v472_v12 }
 0x346   :  { %v468_v15 = vpop.f32.mrf.mxu1 }
 0x347   :  { %1910 = vmatmul.mubr.msk.bf16.vlgmr.msra.gmra.mxu1 %vm363_vm9, %v473_v14  ;;  %v838_v15 = vpop.permute.xlu1 %837 }
 0x348   :  { %v1888_v16 = vpop.f32.mrf.mxu1  ;;  %1921 = vmatprep.mubr.msk.bf16.mxu1 %vm2232_vm0, %v2231_v0 }
 0x349   :  { %v109_v16 = vld [vmem:[#allocation10 + $0x8] sm:$0xf] }
 0x37d   :  { %v533_v17 = vpop.xlane.xlu0 %532 }
 0x37e   :  { %2068 = vrcp.f32 %v533_v17  ;;  %v2512_v17 = vsel %vm589_vm12, %v109_v16, 0  ;;  %v1065_v16 = vrot.slane %v2338_v32, 6  ;;  %v1007_v32 = vrot.slane %v2387_v21, 6 }
 0x37f   :  { %v1013_v21 = vrot.slane %v2393_v24, 3 }
 0x38b   :  { %v2069_v27 = vpop.eup %2068 }
 0x3b5   :  { %v577_v28 = vpop.f32.mrf.mxu1 }
 0x3b6   :  { %v584_v41 = vmul.f32 %v2069_v27, %v577_v28 }
 0x3b7   :  { %v1899_v42 = vpop.f32.mrf.mxu1 }
 0x3b8   :  { %v585_v43 = vpack.c.bf16 %v584_v41, %v584_v41 }
 0x3b9   :  { %v580_v44 = vpop.f32.mrf.mxu1 }
 0x3ba   :  { %1904 = vmatmul.mubr.msk.bf16.vlgmr.msra.gmra.mxu0 %vm363_vm9, %v585_v43 }
 0x3bb   :  { %1914 = vmatpush3.bf16.xpose.msra.mxu0 %v687_v45  ;;  %v1900_v46 = vpop.f32.mrf.mxu1  ;;  %1915 = vmatprep.mubr.msk.bf16.mxu0 %vm2232_vm0, %v2231_v0 }
 0x3bc   :  { %1925 = vmatprep.subr.bf16.mxu0 %v2231_v0 }
 0x3c2   :  { %1916 = vmatmul.mubr.msk.bf16.vlgmr.msra.gmra.mxu0 %vm363_vm9, %v680_v8 }
 0x3c3   :  { %1927 = vmatprep.mubr.msk.bf16.mxu0 %vm2232_vm0, %v2231_v0  ;;  %1926 = vmatpush3.bf16.msra.mxu0 %v2512_v17 }
 0x3c4   :  { %1937 = vmatprep.subr.bf16.mxu0 %v2231_v0 }
 0x407   :  { %v2489_v47 = vpop.f32.mrf.mxu1 }
 0x409   :  { %v1911_v48 = vpop.f32.mrf.mxu1 }
 0x40b   :  { %v676_v49 = vpop.f32.mrf.mxu1 }
 0x40d   :  { %v1912_v50 = vpop.f32.mrf.mxu1 }
 0x47a   :  { %v2491_v51 = vpop.f32.mrf.mxu0 }
 0x47c   :  { %v1905_v52 = vpop.f32.mrf.mxu0 }
 0x47e   :  { %v630_v53 = vpop.f32.mrf.mxu0 }
 0x480   :  { %v1906_v54 = vpop.f32.mrf.mxu0 }
 0x482   :  { %v723_v56 = vpop.f32.mrf.mxu0 }
 0x483   :  { %v729_v57 = vsel %vm410_vm11, %v723_v56, -inf }
 0x484   :  { %730 = vmax.xlane.f32.xlu0 %v729_v57  ;;  %v1917_v58 = vpop.f32.mrf.mxu0 }
 0x486   :  { %v726_v59 = vpop.f32.mrf.mxu0 }
 0x488   :  { %v1918_v60 = vpop.f32.mrf.mxu0 }
 0x49a   :  { %739 = vrot.lane.b32.xlu0 %v2424_v61, %s2238_s14 }
 0x49e   :  { %839 = vrot.lane.b32.xlu0 %v2424_v61, %s2237_s13 }
 0x50d   :  { %v731_v62 = vpop.xlane.xlu0 %730 }
 0x50e   :  { %v732_v5 = vsub.f32 %v723_v56, %v731_v62 }
 0x510   :  { %v733_v7 = vmul.f32 1.442695, %v732_v5  ;;  %v110_v5 = vld [vmem:[#allocation10 + $0xc] sm:$0xf] }
 0x511   :  { %v740_v8 = vpop.permute.xlu0 %739 }
 0x512   :  { %2070 = vpow2.f32 %v733_v7  ;;  %v745_v9 = vsel %vm427_vm10, %v740_v8, 0  ;;  %v2531_v7 = vsel %vm589_vm12, %v110_v5, 0 }
 0x513   :  { %1920 = vmatpush3.bf16.msra.mxu1 %v745_v9 }
 0x514   :  { %1931 = vmatprep.subr.bf16.mxu1 %v2231_v0 }
 0x515   :  { %v840_v11 = vpop.permute.xlu0 %839 }
 0x516   :  { %v845_v14 = vsel %vm363_vm9, %v840_v11, 0 }
 0x51f   :  { %v2071_v10 = vpop.eup %2070 }
 0x520   :  { %v735_v12 = vsel %vm410_vm11, %v2071_v10, 0.0  ;;  %v738_v13 = vpack.c.bf16 %v2071_v10, %v2071_v10 }
 0x521   :  { %736 = vadd.xlane.f32.xlu0 %v735_v12 }
 0x522   :  { %1922 = vmatmul.mubr.msk.bf16.vlgmr.msra.gmra.mxu1 %vm410_vm11, %v738_v13  ;;  %v1075_v13 = vrot.slane %v2348_v37, 1  ;;  %v1071_v37 = vrot.slane %v2344_v35, 3 }
 0x523   :  { %1932 = vmatpush3.bf16.xpose.msra.mxu1 %v845_v14  ;;  %1933 = vmatprep.mubr.msk.bf16.mxu1 %vm2232_vm0, %v2231_v0  ;;  %v1063_v14 = vrot.slane %v2336_v31, 7 }
 0x524   :  { %1943 = vmatprep.subr.bf16.mxu1 %v2231_v0  ;;  %v1076_v31 = vsel %vm177_vm1, %v2350_v38, %v1075_v13 }
 0x52a   :  { %1934 = vmatmul.mubr.msk.bf16.vlgmr.msra.gmra.mxu1 %vm363_vm9, %v838_v15  ;;  %v1077_v15 = vrot.slane %v2353_v39, 7 }
 0x52b   :  { %1945 = vmatprep.mubr.msk.bf16.mxu1 %vm2232_vm0, %v2231_v0  ;;  %1944 = vmatpush3.bf16.msra.mxu1 %v2531_v7 }
 0x52c   :  { %1957 = vmatprep.subr.bf16.mxu1 %v2231_v0 }
 0x537   :  { %897 = vrot.lane.b32.xlu0 %v2424_v61, %s2239_s15 }
 0x5aa   :  { %v737_v27 = vpop.xlane.xlu0 %736 }
 0x5ab   :  { %2072 = vrcp.f32 %v737_v27  ;;  %v1079_v27 = vrot.slane %v2355_v40, 6  ;;  %v1073_v40 = vrot.slane %v2346_v36, 2  ;;  %v1015_v36 = vrot.slane %v2395_v26, 2 }
 0x5ae   :  { %v898_v43 = vpop.permute.xlu0 %897 }
 0x5af   :  { %v903_v48 = vsel %vm427_vm10, %v898_v43, 0 }
 0x5b8   :  { %v2073_v28 = vpop.eup %2072 }
 0x5e2   :  { %v781_v41 = vpop.f32.mrf.mxu1 }
 0x5e3   :  { %v788_v42 = vmul.f32 %v2073_v28, %v781_v41  ;;  %v1069_v28 = vrot.slane %v2342_v34, 4  ;;  %v1005_v41 = vrot.slane %v2384_v20, 7  ;;  %v1009_v34 = vrot.slane %v2389_v22, 5 }
 0x5e4   :  { %v1923_v44 = vpop.f32.mrf.mxu1 }
 0x5e5   :  { %v789_v45 = vpack.c.bf16 %v788_v42, %v788_v42 }
 0x5e6   :  { %v784_v46 = vpop.f32.mrf.mxu1 }
 0x5e7   :  { %1928 = vmatmul.mubr.msk.bf16.vlgmr.msra.gmra.mxu0 %vm363_vm9, %v789_v45 }
 0x5e8   :  { %1938 = vmatpush3.bf16.msra.mxu0 %v903_v48  ;;  %v1924_v61 = vpop.f32.mrf.mxu1  ;;  %1939 = vmatprep.mubr.msk.bf16.mxu0 %vm2232_vm0, %v2231_v0 }
 0x5e9   :  { %1949 = vmatprep.subr.bf16.mxu0 %v2231_v0 }
 0x5ea   :  { %v881_v49 = vpop.f32.mrf.mxu1 }
 0x5eb   :  { %v887_v50 = vsel %vm410_vm11, %v881_v49, -inf }
 0x5ec   :  { %888 = vmax.xlane.f32.xlu1 %v887_v50  ;;  %v1935_v52 = vpop.f32.mrf.mxu1 }
 0x5ee   :  { %v884_v53 = vpop.f32.mrf.mxu1 }
 0x5f0   :  { %v1936_v54 = vpop.f32.mrf.mxu1 }
 0x675   :  { %v889_v56 = vpop.xlane.xlu1 %888 }
 0x676   :  { %v890_v57 = vsub.f32 %v881_v49, %v889_v56 }
 0x678   :  { %v891_v58 = vmul.f32 1.442695, %v890_v57 }
 0x67a   :  { %2074 = vpow2.f32 %v891_v58 }
 0x687   :  { %v2075_v59 = vpop.eup %2074 }
 0x688   :  { %v893_v60 = vsel %vm410_vm11, %v2075_v59, 0.0  ;;  %v896_v62 = vpack.c.bf16 %v2075_v59, %v2075_v59 }
 0x689   :  { %894 = vadd.xlane.f32.xlu1 %v893_v60 }
 0x68a   :  { %1940 = vmatmul.mubr.msk.bf16.vlgmr.msra.gmra.mxu0 %vm410_vm11, %v896_v62 }
 0x68b   :  { %1950 = vmatpush3.bf16.msra.mxu0 %v2323_v3  ;;  %1953 = vmatprep.mubr.msk.bf16.mxu0 %vm2232_vm0, %v2231_v0  ;;  %v674_v3 = vadd.f32 %v2489_v47, %v2491_v51  ;;  %v1067_v47 = vrot.slane %v2340_v33, 5  ;;  %v1003_v51 = vrot.slane %v2380_v18, 1  ;;  %v1078_v33 = vsel %vm180_vm2, %v1077_v15, %v1076_v31 }
 0x68c   :  { %1951 = vmatprep.subr.bf16.mxu0 %v2231_v0  ;;  %v1080_v20 = vsel %vm183_vm3, %v1079_v27, %v1078_v33 }
 0x68d   :  { %v1004_v35 = vsel %vm177_vm1, %v2382_v19, %v1003_v51 }
 0x68e   :  { %v1006_v43 = vsel %vm180_vm2, %v1005_v41, %v1004_v35 }
 0x68f   :  { %1952 = vmatpush3.bf16.msra.mxu0 %v2333_v30  ;;  %v1061_v30 = vrot.slane %v2329_v25, 1  ;;  %v1008_v44 = vsel %vm183_vm3, %v1007_v32, %v1006_v43 }
 0x690   :  { %1965 = vmatprep.subr.bf16.mxu0 %v2231_v0 }
 0x691   :  { %v1062_v25 = vsel %vm177_vm1, %v2331_v29, %v1061_v30  ;;  %v1011_v29 = vrot.slane %v2391_v23, 4  ;;  %v1010_v23 = vsel %vm186_vm4, %v1009_v34, %v1008_v44 }
 0x692   :  { %v1064_v39 = vsel %vm180_vm2, %v1063_v14, %v1062_v25 }
 0x693   :  { %v1066_v18 = vsel %vm183_vm3, %v1065_v16, %v1064_v39  ;;  %v1012_v48 = vsel %vm189_vm5, %v1011_v29, %v1010_v23 }
 0x694   :  { %v1068_v38 = vsel %vm186_vm4, %v1067_v47, %v1066_v18  ;;  %v1014_v19 = vsel %vm192_vm6, %v1013_v21, %v1012_v48 }
 0x695   :  { %v1070_v42 = vsel %vm189_vm5, %v1069_v28, %v1068_v38  ;;  %v1016_v24 = vsel %vm195_vm7, %v1015_v36, %v1014_v19 }
 0x696   :  { %v1072_v22 = vsel %vm192_vm6, %v1071_v37, %v1070_v42  ;;  %v1017_v61 = vpack.c.b16 %v1016_v24, %v1016_v24 }
 0x697   :  { %v1074_v45 = vsel %vm195_vm7, %v1073_v40, %v1072_v22 }
 0x698   :  { %v1081_v46 = vpack.c.b16 %v1080_v20, %v1074_v45  ;;  %1954 = vmatmul.mubr.msk.bf16.vlgmr.msra.gmra.mxu0 %vm210_vm8, %v1017_v61 }
 0x699   :  { %1967 = vmatprep.mubr.msk.bf16.mxu0 %vm2232_vm0, %v2231_v0 }
 0x6a7   :  { %v830_v8 = vpop.f32.mrf.mxu0 }
 0x6a8   :  { %v2537_v9 = vadd.f32 %v830_v8, %v674_v3 }
 0x6a9   :  { %v1929_v10 = vpop.f32.mrf.mxu0 }
 0x6ab   :  { %v833_v11 = vpop.f32.mrf.mxu0 }
 0x6ad   :  { %v1930_v12 = vpop.f32.mrf.mxu0 }
 0x712   :  { %v895_v26 = vpop.xlane.xlu1 %894 }
 0x713   :  { %2076 = vrcp.f32 %v895_v26 }
 0x720   :  { %v2077_v49 = vpop.eup %2076 }
 0x74a   :  { %v939_v50 = vpop.f32.mrf.mxu0 }
 0x74b   :  { %v946_v52 = vmul.f32 %v2077_v49, %v939_v50 }
 0x74c   :  { %v1941_v53 = vpop.f32.mrf.mxu0 }
 0x74d   :  { %v947_v54 = vpack.c.bf16 %v946_v52, %v946_v52 }
 0x74e   :  { %v942_v56 = vpop.f32.mrf.mxu0 }
 0x74f   :  { %1946 = vmatmul.mubr.msk.bf16.vlgmr.msra.gmra.mxu1 %vm363_vm9, %v947_v54 }
 0x750   :  { %v1942_v57 = vpop.f32.mrf.mxu0  ;;  %1958 = vmatpush3.bf16.msra.mxu1 %v2318_v1  ;;  %1961 = vmatprep.mubr.msk.bf16.mxu1 %vm2232_vm0, %v2231_v0 }
 0x751   :  { %1959 = vmatprep.subr.bf16.mxu1 %v2231_v0 }
 0x754   :  { %1960 = vmatpush3.bf16.msra.mxu1 %v2320_v2  ;;  %v2597_v2 = vld [vmem:[%s2706_s7] ss:$0 sm:$0xff]  ;;  %s2240_s7 = smov [#allocation11]  }
 0x755   :  { %1971 = vmatprep.subr.bf16.mxu1 %v2231_v0  ;;  %s1752_s18 = sshll.u32 %s2240_s7, 4  ;;  %s1753_s18 = int_to_ptr.vmem [resolvable:$true] %s1752_s18 }
 0x756   :  { %s2194_s19 = scalar_lea.vmem %s1753_s18, 256  ;;  %p2199_p12 = scmp.lt.s32.totalorder %s1753_s18, %s1753_s18 }
 0x757   :  { %1962 = vmatmul.mubr.msk.bf16.vlgmr.msra.gmra.mxu1 %vm210_vm8, %v1081_v46  ;;  %p2195_p11 = scmp.ne.s32.totalorder %s1753_s18, %s2194_s19  ;;  %p2200_p13 = scmp.lt.s32.totalorder %s2194_s19, %s2194_s19 }
 0x758   :  { %1973 = vmatprep.mubr.msk.bf16.mxu1 %vm2232_vm0, %v2231_v0  ;;  %v1055_v58 = vpop.f32.mrf.mxu0 }
 0x759   :  { %v1056_v59 = vadd.f32 %v2433_v63, %v1055_v58  ;;  %p2201_p0 = por %p2200_p13, %p2199_p12 }
 0x75a   :  { %v1955_v60 = vpop.f32.mrf.mxu0 }
 0x75b   :  { %v2590_v62 = vpack.c.bf16 %v1056_v59, %v1056_v59  ;;  %p2202_p1 = pnand %p2201_p0, %p2195_p11 }
 0x75c   :  { %v1058_v1 = vpop.f32.mrf.mxu0 }
 0x75d   :  { %1237 = vrot.lane.b32.xlu1 %v2590_v62, %s2233_s9 }
 0x75e   :  { %v1956_v5 = vpop.f32.mrf.mxu0 }
 0x7cf   :  { %v1238_v28 = vpop.permute.xlu1 %1237 }
 0x80f   :  { %v988_v3 = vpop.f32.mrf.mxu1 }
 0x810   :  { %v994_v8 = vadd.f32 %v988_v3, %v2537_v9 }
 0x811   :  { %v1947_v10 = vpop.f32.mrf.mxu1 }
 0x812   :  { %v1001_v11 = vadd.f32 %v2597_v2, %v994_v8 }
 0x813   :  { %v991_v63 = vpop.f32.mrf.mxu1 }
 0x814   :  { %1002 = vst.msk [vmem:[#allocation11] sm:$0xff] %vm210_vm8, %v1001_v11 }
 0x815   :  { %v1948_v12 = vpop.f32.mrf.mxu1 }
 0x817   :  { %v1119_v30 = vpop.f32.mrf.mxu1 }
 0x818   :  { %v1120_v15 = vadd.f32 %v2420_v55, %v1119_v30 }
 0x819   :  { %v1963_v13 = vpop.f32.mrf.mxu1 }
 0x81b   :  { %v1122_v14 = vpop.f32.mrf.mxu1 }
 0x81c   :  { %v1123_v16 = vadd.f32 %v2420_v55, %v1122_v14 }
 0x81d   :  { %v1964_v27 = vpop.f32.mrf.mxu1 }
 0x81e   :  { %v2604_v47 = vpack.c.bf16 %v1123_v16, %v1120_v15 }
 0x820   :  { %1239 = vrot.lane.b32.xlu0 %v2604_v47, %s2233_s9  ;;  %v1132_v9 = vsel %vm363_vm9, %v2604_v47, 0 }
 0x821   :  { %1966 = vmatpush3.bf16.xpose.msra.mxu0 %v1132_v9 }
 0x822   :  { %1977 = vmatprep.subr.bf16.mxu0 %v2231_v0 }
 0x828   :  { %1968 = vmatmul.mubr.msk.bf16.vlgmr.msra.gmra.mxu0 %vm363_vm9, %v2590_v62 }
 0x829   :  { %1979 = vmatprep.mubr.msk.bf16.mxu0 %vm2232_vm0, %v2231_v0 }
 0x892   :  { %v1240_v51 = vpop.permute.xlu0 %1239 }
 0x893   :  { %v1245_v55 = vsel %vm363_vm9, %v1240_v51, 0 }
 0x894   :  { %1978 = vmatpush3.bf16.xpose.msra.mxu0 %v1245_v55 }
 0x895   :  { %1989 = vmatprep.subr.bf16.mxu0 %v2231_v0 }
 0x89b   :  { %1980 = vmatmul.mubr.msk.bf16.vlgmr.msra.gmra.mxu0 %vm363_vm9, %v1238_v28 }
 0x89c   :  { %1990 = vmatpush3.bf16.msra.mxu0 %v2474_v6  ;;  %1991 = vmatprep.mubr.msk.bf16.mxu0 %vm2232_vm0, %v2231_v0 }
 0x89d   :  { %2001 = vmatprep.subr.bf16.mxu0 %v2231_v0 }
 0x8e8   :  { %v1168_v41 = vpop.f32.mrf.mxu0 }
 0x8e9   :  { %v1174_v25 = vsel %vm410_vm11, %v1168_v41, -inf }
 0x8ea   :  { %1175 = vmax.xlane.f32.xlu0 %v1174_v25  ;;  %v1969_v31 = vpop.f32.mrf.mxu0 }
 0x8ec   :  { %v1171_v37 = vpop.f32.mrf.mxu0 }
 0x8ee   :  { %v1970_v32 = vpop.f32.mrf.mxu0 }
 0x900   :  { %1185 = vrot.lane.b32.xlu0 %v2604_v47, %s2234_s11 }
 0x95b   :  { %v1281_v39 = vpop.f32.mrf.mxu0 }
 0x95c   :  { %v1287_v33 = vsel %vm410_vm11, %v1281_v39, -inf }
 0x95d   :  { %1288 = vmax.xlane.f32.xlu1 %v1287_v33  ;;  %v1981_v6 = vpop.f32.mrf.mxu0 }
 0x95f   :  { %v1284_v40 = vpop.f32.mrf.mxu0 }
 0x961   :  { %v1982_v34 = vpop.f32.mrf.mxu0 }
 0x96e   :  { %1297 = vrot.lane.b32.xlu1 %v2604_v47, %s2235_s5 }
 0x972   :  { %1436 = vrot.lane.b32.xlu1 %v2604_v47, %s2236_s12 }
 0x973   :  { %v1176_v18 = vpop.xlane.xlu0 %1175 }
 0x974   :  { %v1177_v20 = vsub.f32 %v1168_v41, %v1176_v18 }
 0x976   :  { %v1178_v29 = vmul.f32 1.442695, %v1177_v20  ;;  %1434 = vrot.lane.b32.xlu1 %v2590_v62, %s2236_s12 }
 0x977   :  { %v1186_v38 = vpop.permute.xlu0 %1185 }
 0x978   :  { %2078 = vpow2.f32 %v1178_v29  ;;  %v1191_v35 = vsel %vm427_vm10, %v1186_v38, 0 }
 0x979   :  { %1972 = vmatpush3.bf16.msra.mxu1 %v1191_v35 }
 0x97a   :  { %1983 = vmatprep.subr.bf16.mxu1 %v2231_v0 }
 0x985   :  { %v2079_v21 = vpop.eup %2078 }
 0x986   :  { %v1183_v42 = vpack.c.bf16 %v2079_v21, %v2079_v21  ;;  %v1180_v43 = vsel %vm410_vm11, %v2079_v21, 0.0 }
 0x988   :  { %1974 = vmatmul.mubr.msk.bf16.vlgmr.msra.gmra.mxu1 %vm410_vm11, %v1183_v42 }
 0x989   :  { %1985 = vmatprep.mubr.msk.bf16.mxu1 %vm2232_vm0, %v2231_v0 }
 0x99a   :  { %1181 = vadd.xlane.f32.xlu1 %v1180_v43 }
 0x9ab   :  { %1589 = vrot.lane.b32.xlu1 %v2590_v62, %s2237_s13 }
 0x9e6   :  { %v1289_v36 = vpop.xlane.xlu1 %1288 }
 0x9e7   :  { %v1290_v22 = vsub.f32 %v1281_v39, %v1289_v36 }
 0x9e9   :  { %v1291_v44 = vmul.f32 1.442695, %v1290_v22 }
 0x9ea   :  { %v1298_v45 = vpop.permute.xlu1 %1297 }
 0x9eb   :  { %2080 = vpow2.f32 %v1291_v44  ;;  %v1303_v23 = vsel %vm427_vm10, %v1298_v45, 0 }
 0x9ec   :  { %1984 = vmatpush3.bf16.msra.mxu1 %v1303_v23 }
 0x9ed   :  { %1995 = vmatprep.subr.bf16.mxu1 %v2231_v0 }
 0x9ee   :  { %v1437_v24 = vpop.permute.xlu1 %1436 }
 0x9ef   :  { %v1442_v3 = vsel %vm363_vm9, %v1437_v24, 0 }
 0x9f2   :  { %v1435_v61 = vpop.permute.xlu1 %1434 }
 0x9f8   :  { %v2081_v46 = vpop.eup %2080 }
 0x9f9   :  { %v1293_v48 = vsel %vm410_vm11, %v2081_v46, 0.0  ;;  %v1296_v19 = vpack.c.bf16 %v2081_v46, %v2081_v46 }
 0x9fa   :  { %1294 = vadd.xlane.f32.xlu0 %v1293_v48 }
 0x9fb   :  { %1986 = vmatmul.mubr.msk.bf16.vlgmr.msra.gmra.mxu1 %vm410_vm11, %v1296_v19 }
 0x9fc   :  { %1996 = vmatpush3.bf16.msra.mxu1 %v2466_v4  ;;  %1997 = vmatprep.mubr.msk.bf16.mxu1 %vm2232_vm0, %v2231_v0 }
 0x9fd   :  { %2007 = vmatprep.subr.bf16.mxu1 %v2231_v0 }
 0xa23   :  { %v1182_v26 = vpop.xlane.xlu1 %1181 }
 0xa24   :  { %2082 = vrcp.f32 %v1182_v26 }
 0xa27   :  { %v1590_v40 = vpop.permute.xlu1 %1589 }
 0xa31   :  { %v2083_v49 = vpop.eup %2082 }
 0xa48   :  { %v1227_v50 = vpop.f32.mrf.mxu1 }
 0xa49   :  { %v1234_v52 = vmul.f32 %v2083_v49, %v1227_v50 }
 0xa4a   :  { %v1975_v53 = vpop.f32.mrf.mxu1 }
 0xa4b   :  { %v1235_v54 = vpack.c.bf16 %v1234_v52, %v1234_v52 }
 0xa4c   :  { %v1230_v56 = vpop.f32.mrf.mxu1 }
 0xa4d   :  { %1998 = vmatmul.mubr.msk.bf16.vlgmr.msra.gmra.mxu1 %vm363_vm9, %v1235_v54 }
 0xa4e   :  { %v1976_v57 = vpop.f32.mrf.mxu1  ;;  %2009 = vmatprep.mubr.msk.bf16.mxu1 %vm2232_vm0, %v2231_v0 }
 0xa83   :  { %v1295_v4 = vpop.xlane.xlu0 %1294 }
 0xa84   :  { %2084 = vrcp.f32 %v1295_v4 }
 0xa91   :  { %v2085_v58 = vpop.eup %2084 }
 0xabb   :  { %v1339_v59 = vpop.f32.mrf.mxu1 }
 0xabc   :  { %v1346_v60 = vmul.f32 %v2085_v58, %v1339_v59 }
 0xabd   :  { %v1987_v62 = vpop.f32.mrf.mxu1 }
 0xabe   :  { %v1347_v1 = vpack.c.bf16 %v1346_v60, %v1346_v60 }
 0xabf   :  { %v1342_v5 = vpop.f32.mrf.mxu1 }
 0xac0   :  { %1992 = vmatmul.mubr.msk.bf16.vlgmr.msra.gmra.mxu0 %vm363_vm9, %v1347_v1 }
 0xac1   :  { %2002 = vmatpush3.bf16.xpose.msra.mxu0 %v1442_v3  ;;  %v1988_v8 = vpop.f32.mrf.mxu1  ;;  %2003 = vmatprep.mubr.msk.bf16.mxu0 %vm2232_vm0, %v2231_v0 }
 0xac2   :  { %2013 = vmatprep.subr.bf16.mxu0 %v2231_v0 }
 0xac8   :  { %2004 = vmatmul.mubr.msk.bf16.vlgmr.msra.gmra.mxu0 %vm363_vm9, %v1435_v61 }
 0xac9   :  { %2014 = vmatpush3.bf16.msra.mxu0 %v2512_v17  ;;  %2015 = vmatprep.mubr.msk.bf16.mxu0 %vm2232_vm0, %v2231_v0 }
 0xaca   :  { %2025 = vmatprep.subr.bf16.mxu0 %v2231_v0 }
 0xb0d   :  { %v2661_v10 = vpop.f32.mrf.mxu1 }
 0xb0f   :  { %v1999_v11 = vpop.f32.mrf.mxu1 }
 0xb11   :  { %v1431_v63 = vpop.f32.mrf.mxu1 }
 0xb13   :  { %v2000_v12 = vpop.f32.mrf.mxu1 }
 0xb80   :  { %v2663_v30 = vpop.f32.mrf.mxu0 }
 0xb82   :  { %v1993_v13 = vpop.f32.mrf.mxu0 }
 0xb84   :  { %v1388_v14 = vpop.f32.mrf.mxu0 }
 0xb86   :  { %v1994_v15 = vpop.f32.mrf.mxu0 }
 0xb88   :  { %v1478_v16 = vpop.f32.mrf.mxu0 }
 0xb89   :  { %v1484_v27 = vsel %vm410_vm11, %v1478_v16, -inf }
 0xb8a   :  { %1485 = vmax.xlane.f32.xlu0 %v1484_v27  ;;  %v2005_v17 = vpop.f32.mrf.mxu0 }
 0xb8c   :  { %v1481_v9 = vpop.f32.mrf.mxu0 }
 0xb8e   :  { %v2006_v51 = vpop.f32.mrf.mxu0 }
 0xba0   :  { %1494 = vrot.lane.b32.xlu0 %v2604_v47, %s2238_s14 }
 0xba4   :  { %1591 = vrot.lane.b32.xlu0 %v2604_v47, %s2237_s13 }
 0xc13   :  { %v1486_v55 = vpop.xlane.xlu0 %1485 }
 0xc14   :  { %v1487_v28 = vsub.f32 %v1478_v16, %v1486_v55 }
 0xc16   :  { %v1488_v41 = vmul.f32 1.442695, %v1487_v28 }
 0xc17   :  { %v1495_v25 = vpop.permute.xlu0 %1494 }
 0xc18   :  { %2086 = vpow2.f32 %v1488_v41  ;;  %v1500_v31 = vsel %vm427_vm10, %v1495_v25, 0 }
 0xc19   :  { %2008 = vmatpush3.bf16.msra.mxu1 %v1500_v31 }
 0xc1a   :  { %2019 = vmatprep.subr.bf16.mxu1 %v2231_v0 }
 0xc1b   :  { %v1592_v32 = vpop.permute.xlu0 %1591 }
 0xc1c   :  { %v1597_v6 = vsel %vm363_vm9, %v1592_v32, 0 }
 0xc25   :  { %v2087_v37 = vpop.eup %2086 }
 0xc26   :  { %v1490_v39 = vsel %vm410_vm11, %v2087_v37, 0.0  ;;  %v1493_v33 = vpack.c.bf16 %v2087_v37, %v2087_v37 }
 0xc27   :  { %1491 = vadd.xlane.f32.xlu0 %v1490_v39 }
 0xc28   :  { %2010 = vmatmul.mubr.msk.bf16.vlgmr.msra.gmra.mxu1 %vm410_vm11, %v1493_v33 }
 0xc29   :  { %2020 = vmatpush3.bf16.xpose.msra.mxu1 %v1597_v6  ;;  %2021 = vmatprep.mubr.msk.bf16.mxu1 %vm2232_vm0, %v2231_v0 }
 0xc2a   :  { %2031 = vmatprep.subr.bf16.mxu1 %v2231_v0 }
 0xc30   :  { %2022 = vmatmul.mubr.msk.bf16.vlgmr.msra.gmra.mxu1 %vm363_vm9, %v1590_v40 }
 0xc31   :  { %2032 = vmatpush3.bf16.msra.mxu1 %v2531_v7  ;;  %2033 = vmatprep.mubr.msk.bf16.mxu1 %vm2232_vm0, %v2231_v0 }
 0xc3d   :  { %1649 = vrot.lane.b32.xlu0 %v2604_v47, %s2239_s15 }
 0xcb0   :  { %v1492_v34 = vpop.xlane.xlu0 %1491 }
 0xcb1   :  { %2088 = vrcp.f32 %v1492_v34 }
 0xcb4   :  { %v1650_v38 = vpop.permute.xlu0 %1649 }
 0xcb5   :  { %v1655_v43 = vsel %vm427_vm10, %v1650_v38, 0 }
 0xcbe   :  { %v2089_v18 = vpop.eup %2088 }
 0xce8   :  { %v1536_v20 = vpop.f32.mrf.mxu1 }
 0xce9   :  { %v1543_v29 = vmul.f32 %v2089_v18, %v1536_v20 }
 0xcea   :  { %v2011_v35 = vpop.f32.mrf.mxu1 }
 0xceb   :  { %v1544_v21 = vpack.c.bf16 %v1543_v29, %v1543_v29 }
 0xcec   :  { %v1539_v42 = vpop.f32.mrf.mxu1 }
 0xced   :  { %2016 = vmatmul.mubr.msk.bf16.vlgmr.msra.gmra.mxu0 %vm363_vm9, %v1544_v21 }
 0xcee   :  { %2026 = vmatpush3.bf16.msra.mxu0 %v1655_v43  ;;  %v2012_v7 = vpop.f32.mrf.mxu1  ;;  %2027 = vmatprep.mubr.msk.bf16.mxu0 %vm2232_vm0, %v2231_v0  ;;  %v1429_v0 = vadd.f32 %v2661_v10, %v2663_v30 }
 0xcf0   :  { %v1633_v36 = vpop.f32.mrf.mxu1 }
 0xcf1   :  { %v1639_v47 = vsel %vm410_vm11, %v1633_v36, -inf }
 0xcf2   :  { %1640 = vmax.xlane.f32.xlu1 %v1639_v47  ;;  %v2023_v22 = vpop.f32.mrf.mxu1 }
 0xcf4   :  { %v1636_v44 = vpop.f32.mrf.mxu1 }
 0xcf6   :  { %v2024_v45 = vpop.f32.mrf.mxu1 }
 0xd7b   :  { %v1641_v23 = vpop.xlane.xlu1 %1640 }
 0xd7c   :  { %v1642_v46 = vsub.f32 %v1633_v36, %v1641_v23 }
 0xd7e   :  { %v1643_v48 = vmul.f32 1.442695, %v1642_v46 }
 0xd80   :  { %2090 = vpow2.f32 %v1643_v48 }
 0xd8d   :  { %v2091_v19 = vpop.eup %2090 }
 0xd8e   :  { %v1645_v24 = vsel %vm410_vm11, %v2091_v19, 0.0  ;;  %v1648_v61 = vpack.c.bf16 %v2091_v19, %v2091_v19 }
 0xd8f   :  { %1646 = vadd.xlane.f32.xlu1 %v1645_v24 }
 0xd90   :  { %2028 = vmatmul.mubr.msk.bf16.vlgmr.msra.gmra.mxu0 %vm410_vm11, %v1648_v61 }
 0xdad   :  { %v1582_v26 = vpop.f32.mrf.mxu0 }
 0xdae   :  { %v1588_v49 = vadd.f32 %v1582_v26, %v1429_v0 }
 0xdaf   :  { %v2017_v50 = vpop.f32.mrf.mxu0 }
 0xdb1   :  { %v1585_v52 = vpop.f32.mrf.mxu0 }
 0xdb3   :  { %v2018_v53 = vpop.f32.mrf.mxu0 }
 0xe18   :  { %v1647_v54 = vpop.xlane.xlu1 %1646 }
 0xe19   :  { %2092 = vrcp.f32 %v1647_v54 }
 0xe26   :  { %v2093_v56 = vpop.eup %2092 }
 0xe50   :  { %v1691_v57 = vpop.f32.mrf.mxu0 }
 0xe51   :  { %v1698_v4 = vmul.f32 %v2093_v56, %v1691_v57 }
 0xe52   :  { %v2029_v58 = vpop.f32.mrf.mxu0 }
 0xe53   :  { %v1699_v59 = vpack.c.bf16 %v1698_v4, %v1698_v4 }
 0xe54   :  { %v1694_v60 = vpop.f32.mrf.mxu0 }
 0xe55   :  { %2034 = vmatmul.mubr.msk.bf16.vlgmr.msra.gmra.mxu1 %vm363_vm9, %v1699_v59 }
 0xe56   :  { %v2030_v62 = vpop.f32.mrf.mxu0 }
 0xf15   :  { %v1737_v1 = vpop.f32.mrf.mxu1 }
 0xf16   :  { %v1743_v5 = vadd.f32 %v1737_v1, %v1588_v49 }
 0xf17   :  { %v2035_v3 = vpop.f32.mrf.mxu1 }
 0xf18   :  { %v1744_v8 = vadd.f32 %v2597_v2, %v1743_v5 }
 0xf19   :  { %v1740_v10 = vpop.f32.mrf.mxu1 }
 0xf1a   :  { %1746 = vst.msk [vmem:[#allocation11 + $0x8] sm:$0xff] %vm210_vm8, %v1744_v8 }
 0xf1b   :  { %v2036_v11 = vpop.f32.mrf.mxu1 }
 0xf1c   :  { %2205 = shalt.err (!%p2202_p1)
}
 0xf1d   :  { %s2241_s20 = smov 128   ;;  %s2242_s1 = smov 8  }
 0xf1e   :  { %1758 = dma.vmem_to_hbm [thread:$0]  %s1753_s18, 256, %s2707_s8, [#allocation4], %s2241_s20, %s2241_s20, %s2242_s1  }
 0xf1f   :  { %2220 = dma.done.wait [#allocation4], 256  }
 0xf20   :  { %2221 = vsyncadd [#allocation4], 4294967040 }
 0xf21   :  { %1762 = vsyncpa [#allocation3], 1 }
 0xf22   :  { %1763 = vsyncpa [#allocation6], 1 }
 0xf23   :  { %1764 = vsyncpa [#allocation9], 1 }
 0xf24   :  { %1765 = vsyncpa [#allocation4], 1 }

</bundles_post_ra>
